<compile_context>
chip_gen: v6e
topology: v6e:2x2x1
jax: 0.10.0
libtpu: 0.0.40
codegen_flags: <defaults>
</compile_context>

<pallas_src>
import jax
import jax.numpy as jnp
from jax.experimental import pallas as pl
from jax.experimental.pallas import tpu as pltpu


def _vdn_group_sum_kernel(x_ref, s_ref, o_ref):
    # x_ref: (tile_m, A*L) — flat Q block, agent groups contiguous on lanes.
    # s_ref: (A*L, L)      — constant 0/1 group-sum matrix (DMA'd once).
    # o_ref: (tile_m, L)   — per-group sums, lane-dense output.
    acc = jnp.dot(
        x_ref[...],
        s_ref[...],
        preferred_element_type=jnp.float32,
        precision=jax.lax.Precision.HIGHEST,
    )
    o_ref[...] = acc.astype(o_ref.dtype)


def _group_sum_matrix(n_agents: int, lanes: int, dtype) -> jax.Array:
    # S[c, l] = 1 iff c // n_agents == l, so (x @ S)[:, l] sums group l.
    c = jnp.arange(n_agents * lanes, dtype=jnp.int32)[:, None] // n_agents
    l = jnp.arange(lanes, dtype=jnp.int32)[None, :]
    return (c == l).astype(dtype)


def vdn_net(
    q: jax.Array,
    *,
    lanes: int = 128,
    block_bytes: int = 4 * 1024 * 1024,
    min_rows_for_pallas: int = 1 << 18,
    force_pallas: bool = False,
) -> jax.Array:
    """VDN mixing network: sum agent Q-values over the last axis (keepdim).

    q: [B, T, A]  ->  [B, T, 1]
    """
    B, T, A = q.shape
    N = B * T

    # Small or awkward sizes: let XLA fuse a plain reduce with the producer.
    # (Pallas path requires N % lanes == 0 so the flat view tiles cleanly.)
    if (N % lanes != 0) or (not force_pallas and N < min_rows_for_pallas):
        return jnp.sum(q, axis=-1, keepdims=True)

    C = A * lanes          # input lane width per flat row (multiple of 128)
    M = N // lanes         # number of flat rows

    # Free, contiguous reshape — no extra HBM pass, no transpose, no pad.
    x = q.reshape(M, C)

    dsize = jnp.dtype(q.dtype).itemsize
    tile_m = max(8, block_bytes // (C * dsize))   # ~block_bytes of DMA per step
    tile_m = min(tile_m, M)
    if tile_m != M:
        tile_m = max(8, (tile_m // 8) * 8)        # sublane-aligned block

    grid = (pl.cdiv(M, tile_m),)                  # ragged tail handled by Pallas
    s = _group_sum_matrix(A, lanes, q.dtype)

    out = pl.pallas_call(
        _vdn_group_sum_kernel,
        out_shape=jax.ShapeDtypeStruct((M, lanes), q.dtype),
        grid_spec=pltpu.PrefetchScalarGridSpec(
            num_scalar_prefetch=0,
            grid=grid,
            in_specs=[
                # Lane dim C is the full array dim (and a multiple of 128);
                # sublane dim tile_m is a multiple of 8 or the full dim.
                pl.BlockSpec((tile_m, C), lambda i: (i, 0)),
                # Constant block index -> the group-sum matrix is DMA'd once.
                pl.BlockSpec((C, lanes), lambda i: (0, 0)),
            ],
            out_specs=pl.BlockSpec((tile_m, lanes), lambda i: (i, 0)),
        ),
        compiler_params=pltpu.CompilerParams(
            # Independent tiles: let v7x's two TensorCores split the grid.
            dimension_semantics=("parallel",),
            # Safe on all generations (v5e default scoped is only 16 MiB).
            vmem_limit_bytes=32 * 1024 * 1024,
        ),
    )(x, s)

    # out[m, g] is the sum for flat row n = m*lanes + g -> free reshape back.
    return out.reshape(B, T, 1)


if __name__ == "__main__":
    key = jax.random.PRNGKey(0)
    k1, k2, k3, k4 = jax.random.split(key, 4)

    # 1) Tiny VDN-style shape -> fused XLA fallback path.
    q_small = jax.random.normal(k1, (2, 8, 4), dtype=jnp.float32)
    out = jax.block_until_ready(vdn_net(q_small))
    ref = jnp.sum(q_small, axis=-1, keepdims=True)
    assert out.shape == (2, 8, 1), out.shape
    assert jnp.allclose(out, ref, atol=1e-5, rtol=1e-5), "mismatch (fallback)"

    # 2) Pallas path, single grid step (M == 1 == tile_m).
    q_p1 = jax.random.normal(k2, (2, 64, 4), dtype=jnp.float32)   # N=128 -> M=1
    out = jax.block_until_ready(vdn_net(q_p1, force_pallas=True))
    ref = jnp.sum(q_p1, axis=-1, keepdims=True)
    assert out.shape == (2, 64, 1), out.shape
    assert jnp.allclose(out, ref, atol=1e-4, rtol=1e-4), "mismatch (pallas 1-step)"

    # 3) Pallas path, multi-step grid (small block_bytes forces 4 tiles).
    q_p2 = jax.random.normal(k3, (8, 512, 4), dtype=jnp.float32)  # N=4096 -> M=32
    out = jax.block_until_ready(
        vdn_net(q_p2, force_pallas=True, block_bytes=16 * 1024))
    ref = jnp.sum(q_p2, axis=-1, keepdims=True)
    assert out.shape == (8, 512, 1), out.shape
    assert jnp.allclose(out, ref, atol=1e-4, rtol=1e-4), "mismatch (pallas multi-step)"

    # 4) Pallas path, ragged final tile (M=36, tile_m=8 -> grid=5, last block OOB-masked).
    q_p3 = jax.random.normal(k4, (9, 512, 8), dtype=jnp.float32)  # N=4608 -> M=36
    out = jax.block_until_ready(
        vdn_net(q_p3, force_pallas=True, block_bytes=32 * 1024))
    ref = jnp.sum(q_p3, axis=-1, keepdims=True)
    assert out.shape == (9, 512, 1), out.shape
    assert jnp.allclose(out, ref, atol=1e-4, rtol=1e-4), "mismatch (pallas ragged tail)"

    print("KERNEL_OK")
</pallas_src>

<mosaic_0001>
module attributes {stable_mosaic.version = 11 : i64} {
  func.func @_vdn_group_sum_kernel(%arg0: i32, %arg1: memref<1x512xf32, #tpu.memory_space<vmem>>, %arg2: memref<512x128xf32, #tpu.memory_space<vmem>>, %arg3: memref<1x128xf32, #tpu.memory_space<vmem>>) attributes {dimension_semantics = [#tpu.dimension_semantics<parallel>], iteration_bounds = array<i64: 1>, scalar_prefetch = 0 : i64, scratch_operands = 0 : i64, tpu.core_type = #tpu.core_type<tc>, window_params = [{transform_indices = @transform_0, window_bounds = array<i64: 1, 512>}, {pipeline_mode = #tpu.pipeline_mode<synchronous>, transform_indices = @transform_1, window_bounds = array<i64: 512, 128>}, {transform_indices = @transform_2, window_bounds = array<i64: 1, 128>}]} {
    %c0 = arith.constant 0 : index
    %c0_0 = arith.constant 0 : index
    %0 = vector.load %arg1[%c0, %c0_0] : memref<1x512xf32, #tpu.memory_space<vmem>>, vector<1x512xf32>
    %c0_1 = arith.constant 0 : index
    %c0_2 = arith.constant 0 : index
    %1 = vector.load %arg2[%c0_1, %c0_2] : memref<512x128xf32, #tpu.memory_space<vmem>>, vector<512x128xf32>
    %cst = arith.constant dense<0.000000e+00> : vector<1x128xf32>
    %2 = tpu.matmul %0, %1, %cst {dimension_numbers = #tpu.dot_dimension_numbers<[1], [0], [0], [1], [0, 0, 1, 1], [], []>, precision = #tpu.contract_precision<fp32>} : vector<1x512xf32>, vector<512x128xf32>, vector<1x128xf32> -> vector<1x128xf32>
    %c0_3 = arith.constant 0 : index
    %c0_4 = arith.constant 0 : index
    %3 = vector.load %arg3[%c0_3, %c0_4] : memref<1x128xf32, #tpu.memory_space<vmem>>, vector<1x128xf32>
    tpu.vector_store %arg3[%c0_3, %c0_4], %2 {strides = array<i32>} : memref<1x128xf32, #tpu.memory_space<vmem>>, vector<1x128xf32>,
    return
  }
  func.func @transform_0(%arg0: i32) -> (i32, i32) {
    %c0_i32 = arith.constant 0 : i32
    %c0_i32_0 = arith.constant 0 : i32
    return %arg0, %c0_i32 : i32, i32
  }
  func.func @transform_1(%arg0: i32) -> (i32, i32) {
    %c0_i32 = arith.constant 0 : i32
    %c0_i32_0 = arith.constant 0 : i32
    %c0_i32_1 = arith.constant 0 : i32
    return %c0_i32, %c0_i32_0 : i32, i32
  }
  func.func @transform_2(%arg0: i32) -> (i32, i32) {
    %c0_i32 = arith.constant 0 : i32
    %c0_i32_0 = arith.constant 0 : i32
    return %arg0, %c0_i32 : i32, i32
  }
}

</mosaic_0001>

<bundles_post_ra>
// kernel: tpu_custom_call.1
= control target key start
LH: loop header
LB: loop body
LE: loop exit
PB: predicated region body
PF: predicated region fallthrough
CT: control target
= control target key end

     0   :  { %7 = vsyncpa [#allocation3], 0  ;;  %s3594_s0 = inlined_call_operand.hbm [shape: f32[1,512], index: 0, kind: input, shape index: {}]   ;;  %s3595_s1 = inlined_call_operand.hbm [shape: f32[512,128], index: 1, kind: input, shape index: {}]   ;;  %s3596_s2 = inlined_call_operand.hbm [shape: f32[1,128], index: 2, kind: output, shape index: {}]  }
   0x1   :  { %8 = vsyncpa [#allocation6], 0 }
   0x2   :  { %9 = vsyncpa [#allocation4], 0  ;;  %s2356_s9 = smov [#allocation2]   ;;  %s2357_s11 = smov [#allocation5]  }
   0x3   :  { %s16_s10 = sshll.u32 %s2356_s9, 4  ;;  %s25_s12 = sshll.u32 %s2357_s11, 4  ;;  %s17_s10 = int_to_ptr.vmem [resolvable:$true] %s16_s10  ;;  %s26_s12 = int_to_ptr.vmem [resolvable:$true] %s25_s12 }
   0x4   :  { %s2298_s13 = scalar_lea.vmem %s17_s10, 64  ;;  %p2303_p1 = scmp.lt.s32.totalorder %s17_s10, %s17_s10 }
   0x5   :  { %p2299_p0 = scmp.ne.s32.totalorder %s17_s10, %s2298_s13  ;;  %p2304_p2 = scmp.lt.s32.totalorder %s2298_s13, %s2298_s13 }
   0x7   :  { %p2305_p3 = por %p2304_p2, %p2303_p1 }
   0x9   :  { %p2306_p4 = pnand %p2305_p3, %p2299_p0 }
   0xb   :  { %2309 = shalt.err (!%p2306_p4)
}
   0xc   :  { %19 = dma.hbm_to_vmem [thread:$0]  %s3594_s0, 64, %s17_s10, [#allocation3]  }
   0xd   :  { %s2318_s16 = scalar_lea.vmem %s26_s12, 8192  ;;  %p2323_p6 = scmp.lt.s32.totalorder %s26_s12, %s26_s12 }
   0xe   :  { %p2319_p5 = scmp.ne.s32.totalorder %s26_s12, %s2318_s16  ;;  %p2324_p7 = scmp.lt.s32.totalorder %s2318_s16, %s2318_s16 }
  0x10   :  { %p2325_p8 = por %p2324_p7, %p2323_p6 }
  0x12   :  { %p2326_p9 = pnand %p2325_p8, %p2319_p5 }
  0x14   :  { %2329 = shalt.err (!%p2326_p9)
}
  0x15   :  { %s2358_s17 = smov 128   ;;  %s2359_s18 = smov 8  }
  0x16   :  { %31 = dma.hbm_to_vmem [thread:$0]  %s3595_s1, 8192, %s26_s12, [#allocation6], %s2358_s17, %s2358_s17, %s2359_s18  }
  0x17   :  { %2350 = dma.done.wait [#allocation3], 64  }
  0x18   :  { %2351 = vsyncadd [#allocation3], 4294967232 }
  0x19   :  { %2352 = dma.done.wait [#allocation6], 8192  }
  0x1a   :  { %2353 = vsyncadd [#allocation6], 4294959104  ;;  %v104_v0 = vlaneseq  ;;  %v70_v2 = vld [vmem:[#allocation5 + $0xf8] sm:$0xff]  ;;  %v69_v4 = vld [vmem:[#allocation5 + $0xf0] sm:$0xff]  ;;  %s2360_s0 = smov [#allocation7]  }
  0x1b   :  { %v54_v3 = vld [vmem:[#allocation5 + $0x78] sm:$0xff]  ;;  %v2386_v7 = vand.u32 4294901760, %v70_v2  ;;  %v2390_v9 = vand.u32 4294901760, %v69_v4  ;;  %v53_v10 = vld [vmem:[#allocation5 + $0x70] sm:$0xff]  ;;  %v68_v11 = vld [vmem:[#allocation5 + $0xe8] sm:$0xff]  ;;  %s1855_s1 = sshll.u32 %s2360_s0, 4  ;;  %s1856_s1 = int_to_ptr.vmem [resolvable:$true] %s1855_s1 }
  0x1c   :  { %v2382_v1 = vshrl.u32 %v104_v0, 7  ;;  %v2388_v8 = vand.u32 4294901760, %v54_v3  ;;  %v52_v12 = vld [vmem:[#allocation5 + $0x68] sm:$0xff]  ;;  %v2392_v13 = vand.u32 4294901760, %v53_v10  ;;  %v2394_v14 = vand.u32 4294901760, %v68_v11  ;;  %v67_v16 = vld [vmem:[#allocation5 + $0xe0] sm:$0xff]  ;;  %p2335_p11 = scmp.lt.s32.totalorder %s1856_s1, %s1856_s1 }
  0x1d   :  { %v2396_v15 = vand.u32 4294901760, %v52_v12  ;;  %v51_v17 = vld [vmem:[#allocation5 + $0x60] sm:$0xff]  ;;  %v66_v18 = vld [vmem:[#allocation5 + $0xd8] sm:$0xff]  ;;  %1865 = vmatprep.subr.mxu0 %v2386_v7  ;;  %v2399_v19 = vand.u32 4294901760, %v67_v16  ;;  %v2406_v22 = vsub.f32 %v70_v2, %v2386_v7  ;;  %v2410_v24 = vld [vmem:[#allocation5 + $0xd0] sm:$0xff]  ;;  %v2425_v29 = vsub.f32 %v69_v4, %v2390_v9  ;;  %s2330_s21 = scalar_lea.vmem %s1856_s1, 16 }
  0x1e   :  { %3731 = vst [vmem:[#allocation11_spill] sm:$0xff] %v2382_v1  ;;  %v2401_v20 = vand.u32 4294901760, %v51_v17  ;;  %v2403_v21 = vand.u32 4294901760, %v66_v18  ;;  %v2408_v23 = vld [vmem:[#allocation5 + $0x58] sm:$0xff]  ;;  %v2412_v25 = vld [vmem:[#allocation5 + $0x50] sm:$0xff]  ;;  %1866 = vmatpush3.msra.mxu0 %v2388_v8  ;;  %v2419_v27 = vsub.f32 %v54_v3, %v2388_v8  ;;  %v2422_v28 = vand.u32 4294901760, %v2410_v24  ;;  %p2331_p10 = scmp.ne.s32.totalorder %s1856_s1, %s2330_s21 }
  0x1f   :  { %v2416_v26 = vand.u32 4294901760, %v2408_v23  ;;  %v2427_v30 = vld [vmem:[#allocation5 + $0xc8] sm:$0xff]  ;;  %v2431_v32 = vld [vmem:[#allocation5 + $0xc0] sm:$0xff]  ;;  %1867 = vmatprep.subr.mxu0 %v2390_v9  ;;  %v3608_v33 = vand.u32 4294901760, %v2406_v22  ;;  %v2436_v34 = vand.u32 4294901760, %v2412_v25  ;;  %v2439_v35 = vsub.f32 %v53_v10, %v2392_v13  ;;  %v2477_v50 = vld [vmem:[#allocation5 + $0xb8] sm:$0xff] }
  0x20   :  { %v2429_v31 = vld [vmem:[#allocation5 + $0x48] sm:$0xff]  ;;  %v2442_v36 = vand.u32 4294901760, %v2427_v30  ;;  %1868 = vmatpush3.msra.mxu0 %v2392_v13  ;;  %v3606_v37 = vand.u32 4294901760, %v2419_v27  ;;  %v3605_v38 = vand.u32 4294901760, %v2425_v29  ;;  %v2448_v39 = vsub.f32 %v68_v11, %v2394_v14  ;;  %v2453_v41 = vld [vmem:[#allocation5 + $0x40] sm:$0xff]  ;;  %v2487_v55 = vld [vmem:[#allocation5 + $0x38] sm:$0xff] }
  0x21   :  { %3732 = vst [vmem:[#allocation12_spill] sm:$0xff] %v2436_v34  ;;  %v2451_v40 = vand.u32 4294901760, %v2429_v31  ;;  %1869 = vmatprep.subr.mxu0 %v2394_v14  ;;  %v352_v42 = vsub.f32 %v2406_v22, %v3608_v33  ;;  %v3603_v43 = vand.u32 4294901760, %v2439_v35  ;;  %v2461_v44 = vsub.f32 %v52_v12, %v2396_v15  ;;  %v2494_v60 = vld [vmem:[#allocation5 + $0xb0] sm:$0xff]  ;;  %v2518_v12 = vld [vmem:[#allocation5 + $0xa8] sm:$0xff]  ;;  %s2334_s22 = scalar_lea.vmem %s1856_s1, 32 }
  0x22   :  { %3733 = vst [vmem:[#allocation13_spill] sm:$0xff] %v2442_v36  ;;  %v2464_v45 = vand.u32 4294901760, %v2431_v32  ;;  %1870 = vmatpush3.msra.mxu0 %v2396_v15  ;;  %v240_v46 = vsub.f32 %v2419_v27, %v3606_v37  ;;  %v359_v47 = vsub.f32 %v2425_v29, %v3605_v38  ;;  %v3601_v48 = vand.u32 4294901760, %v2448_v39  ;;  %v2506_v2 = vld [vmem:[#allocation5 + $0x30] sm:$0xff]  ;;  %v2596_v38 = vld [vmem:[#allocation5 + $0x18] sm:$0xff]  ;;  %p2336_p12 = scmp.lt.s32.totalorder %s2334_s22, %s2330_s21 }
  0x23   :  { %3734 = vst [vmem:[#allocation14_spill] sm:$0xff] %v2451_v40  ;;  %v2475_v49 = vsub.f32 %v67_v16, %v2399_v19  ;;  %1871 = vmatprep.subr.mxu0 %v2399_v19  ;;  %v353_v51 = vand.u32 4294901760, %v352_v42  ;;  %v247_v52 = vsub.f32 %v2439_v35, %v3603_v43  ;;  %v3600_v53 = vand.u32 4294901760, %v2461_v44  ;;  %v2609_v33 = vld [vmem:[#allocation5 + $0x90] sm:$0xff] }
  0x24   :  { %3735 = vst [vmem:[#allocation15_spill] sm:$0xff] %v2464_v45  ;;  %v2485_v54 = vand.u32 4294901760, %v2453_v41  ;;  %1872 = vmatpush3.msra.mxu0 %v2401_v20  ;;  %v241_v56 = vand.u32 4294901760, %v240_v46  ;;  %v360_v57 = vand.u32 4294901760, %v359_v47  ;;  %v366_v58 = vsub.f32 %v2448_v39, %v3601_v48  ;;  %v2619_v6 = vld [vmem:[#allocation5 + $0x10] sm:$0xff]  ;;  %p2337_p13 = por %p2336_p12, %p2335_p11 }
  0x25   :  { %v3598_v59 = vand.u32 4294901760, %v2475_v49  ;;  %1873 = vmatprep.subr.mxu0 %v2403_v21  ;;  %1900 = vmatprep.subr.mxu1 %v353_v51  ;;  %v248_v61 = vand.u32 4294901760, %v247_v52  ;;  %v254_v62 = vsub.f32 %v2461_v44, %v3600_v53  ;;  %v2501_v63 = vsub.f32 %v51_v17, %v2401_v20  ;;  %v2575_v53 = vld [vmem:[#allocation5 + $0x20] sm:$0xff] }
  0x26   :  { %3736 = vst [vmem:[#allocation16_spill] sm:$0xff] %v2485_v54  ;;  %v2504_v0 = vand.u32 4294901760, %v2477_v50  ;;  %1874 = vmatpush3.msra.mxu0 %v2416_v26  ;;  %1901 = vmatpush3.msra.mxu1 %v241_v56  ;;  %v367_v3 = vand.u32 4294901760, %v366_v58  ;;  %v2513_v10 = vsub.f32 %v66_v18, %v2403_v21  ;;  %v2516_v11 = vand.u32 4294901760, %v2487_v55  ;;  %v2529_v18 = vld [vmem:[#allocation5 + $0x28] sm:$0xff]  ;;  %p2338_p0 = pnand %p2337_p13, %p2331_p10 }
  0x27   :  { %v373_v4 = vsub.f32 %v2475_v49, %v3598_v59  ;;  %1875 = vmatprep.subr.mxu0 %v2422_v28  ;;  %1902 = vmatprep.subr.mxu1 %v360_v57  ;;  %v255_v16 = vand.u32 4294901760, %v254_v62  ;;  %v3597_v17 = vand.u32 4294901760, %v2501_v63  ;;  %v2524_v42 = vsub.f32 %v2408_v23, %v2416_v26 }
  0x28   :  { %3737 = vst [vmem:[#allocation17_spill] sm:$0xff] %v2504_v0  ;;  %3738 = vst [vmem:[#allocation18_spill] sm:$0xff] %v2516_v11  ;;  %v2527_v46 = vand.u32 4294901760, %v2494_v60  ;;  %1876 = vmatpush3.msra.mxu0 %v2436_v34  ;;  %1903 = vmatpush3.msra.mxu1 %v248_v61  ;;  %v3599_v51 = vand.u32 4294901760, %v2513_v10  ;;  %v2535_v52 = vsub.f32 %v2410_v24, %v2422_v28  ;;  %v2538_v56 = vand.u32 4294901760, %v2506_v2  ;;  %v2552_v24 = vld [vmem:[#allocation5 + $0xa0] sm:$0xff] }
  0x29   :  { %v374_v47 = vand.u32 4294901760, %v373_v4  ;;  %1877 = vmatprep.subr.mxu0 %v2442_v36  ;;  %1904 = vmatprep.subr.mxu1 %v367_v3  ;;  %v261_v23 = vsub.f32 %v2501_v63, %v3597_v17  ;;  %v3602_v57 = vand.u32 4294901760, %v2524_v42  ;;  %v2547_v58 = vsub.f32 %v2412_v25, %v2436_v34 }
  0x2a   :  { %3739 = vst [vmem:[#allocation19_spill] sm:$0xff] %v2527_v46  ;;  %3740 = vst [vmem:[#allocation20_spill] sm:$0xff] %v2538_v56  ;;  %v2550_v61 = vand.u32 4294901760, %v2518_v12  ;;  %1878 = vmatpush3.msra.mxu0 %v2451_v40  ;;  %1905 = vmatpush3.msra.mxu1 %v255_v16  ;;  %v380_v62 = vsub.f32 %v2513_v10, %v3599_v51  ;;  %v3604_v3 = vand.u32 4294901760, %v2535_v52  ;;  %v2564_v25 = vand.u32 4294901760, %v2529_v18 }
  0x2b   :  { %v2561_v4 = vsub.f32 %v2427_v30, %v2442_v36  ;;  %1879 = vmatprep.subr.mxu0 %v2464_v45  ;;  %1906 = vmatprep.subr.mxu1 %v374_v47  ;;  %v262_v17 = vand.u32 4294901760, %v261_v23  ;;  %v268_v16 = vsub.f32 %v2524_v42, %v3602_v57  ;;  %v3607_v59 = vand.u32 4294901760, %v2547_v58  ;;  %v2585_v57 = vld [vmem:[#allocation5 + $0x98] sm:$0xff] }
  0x2c   :  { %3741 = vst [vmem:[#allocation21_spill] sm:$0xff] %v2550_v61  ;;  %3742 = vst [vmem:[#allocation22_spill] sm:$0xff] %v2564_v25  ;;  %v2573_v51 = vsub.f32 %v2429_v31, %v2451_v40  ;;  %1880 = vmatpush3.msra.mxu0 %v2485_v54  ;;  %v381_v30 = vand.u32 4294901760, %v380_v62  ;;  %v387_v47 = vsub.f32 %v2535_v52, %v3604_v3  ;;  %v2583_v48 = vand.u32 4294901760, %v2552_v24  ;;  %v2699_v36 = vld [vmem:[#allocation2] sm:$0xf] }
  0x2d   :  { %v3609_v23 = vand.u32 4294901760, %v2561_v4  ;;  %1907 = vmatpush3.msra.mxu1 %v262_v17  ;;  %1881 = vmatprep.subr.mxu0 %v2504_v0  ;;  %v269_v31 = vand.u32 4294901760, %v268_v16  ;;  %v275_v43 = vsub.f32 %v2547_v58, %v3607_v59  ;;  %v2594_v3 = vsub.f32 %v2431_v32, %v2464_v45  ;;  %3756 = vst [vmem:[#allocation32_spill] sm:$0xff] %v2699_v36 }
  0x2e   :  { %3743 = vst [vmem:[#allocation23_spill] sm:$0xff] %v2583_v48  ;;  %v3610_v62 = vand.u32 4294901760, %v2573_v51  ;;  %1908 = vmatprep.subr.mxu1 %v381_v30  ;;  %1882 = vmatpush3.msra.mxu0 %v2516_v11  ;;  %v388_v37 = vand.u32 4294901760, %v387_v47  ;;  %v2603_v16 = vand.u32 4294901760, %v2575_v53  ;;  %v2607_v59 = vsub.f32 %v2453_v41, %v2485_v54 }
  0x2f   :  { %v394_v17 = vsub.f32 %v2561_v4, %v3609_v23  ;;  %1909 = vmatpush3.msra.mxu1 %v269_v31  ;;  %1883 = vmatprep.subr.mxu0 %v2527_v46  ;;  %v276_v32 = vand.u32 4294901760, %v275_v43  ;;  %v2617_v23 = vand.u32 4294901760, %v2585_v57  ;;  %v2625_v43 = vsub.f32 %v2477_v50, %v2504_v0 }
  0x30   :  { %3744 = vst [vmem:[#allocation24_spill] sm:$0xff] %v2603_v16  ;;  %v282_v30 = vsub.f32 %v2573_v51, %v3610_v62  ;;  %1910 = vmatprep.subr.mxu1 %v388_v37  ;;  %1884 = vmatpush3.msra.mxu0 %v2538_v56  ;;  %v3617_v31 = vand.u32 4294901760, %v2607_v59  ;;  %v2628_v5 = vand.u32 4294901760, %v2596_v38  ;;  %v2630_v62 = vld [vmem:[#allocation5 + $0x88] sm:$0xff]  ;;  %v3747_v37 = vand.u32 4294901760, %v2594_v3 }
  0x31   :  { %3745 = vst [vmem:[#allocation25_spill] sm:$0xff] %v2617_v23  ;;  %v395_v41 = vand.u32 4294901760, %v394_v17  ;;  %1911 = vmatpush3.msra.mxu1 %v276_v32  ;;  %1885 = vmatprep.subr.mxu0 %v2550_v61  ;;  %v2638_v17 = vsub.f32 %v2487_v55, %v2516_v11  ;;  %v2641_v50 = vand.u32 4294901760, %v2609_v33  ;;  %v2650_v0 = vsub.f32 %v2494_v60, %v2527_v46  ;;  %v2655_v55 = vld [vmem:[#allocation5 + $0x8] sm:$0xff]  ;;  %v2666_v60 = vld [vmem:[#allocation5 + $0x80] sm:$0xff] }
  0x32   :  { %3746 = vst [vmem:[#allocation26_spill] sm:$0xff] %v2628_v5  ;;  %v283_v47 = vand.u32 4294901760, %v282_v30  ;;  %v401_v54 = vsub.f32 %v2594_v3, %v3747_v37  ;;  %1886 = vmatpush3.msra.mxu0 %v2564_v25  ;;  %v289_v32 = vsub.f32 %v2607_v59, %v3617_v31  ;;  %v2653_v37 = vand.u32 4294901760, %v2619_v6 }
  0x33   :  { %1912 = vmatprep.subr.mxu1 %v395_v41  ;;  %3748 = vst [vmem:[#allocation27_spill] sm:$0xff] %v2650_v0  ;;  %1887 = vmatprep.subr.mxu0 %v2583_v48  ;;  %v2661_v31 = vsub.f32 %v2506_v2, %v2538_v56  ;;  %v2664_v30 = vand.u32 4294901760, %v2630_v62  ;;  %v3751_v45 = vand.u32 4294901760, %v2625_v43  ;;  %v2675_v11 = vsub.f32 %v2518_v12, %v2550_v61 }
  0x34   :  { %3749 = vst [vmem:[#allocation28_spill] sm:$0xff] %v2653_v37  ;;  %1913 = vmatpush3.msra.mxu1 %v283_v47  ;;  %v402_v41 = vand.u32 4294901760, %v401_v54  ;;  %1888 = vmatpush3.msra.mxu0 %v2603_v16  ;;  %v290_v46 = vand.u32 4294901760, %v289_v32  ;;  %v3753_v2 = vand.u32 4294901760, %v2638_v17  ;;  %v2683_v32 = vand.u32 4294901760, %v2655_v55  ;;  %v2689_v54 = vld [vmem:[#allocation5] sm:$0xff] }
  0x35   :  { %3750 = vst [vmem:[#allocation29_spill] sm:$0xff] %v2664_v30  ;;  %v408_v47 = vsub.f32 %v2625_v43, %v3751_v45  ;;  %3752 = vst [vmem:[#allocation30_spill] sm:$0xff] %v2675_v11  ;;  %1889 = vmatprep.subr.mxu0 %v2617_v23  ;;  %v2687_v45 = vsub.f32 %v2529_v18, %v2564_v25  ;;  %v2697_v40 = vand.u32 4294901760, %v2666_v60  ;;  %v3757_v18 = vand.u32 4294901760, %v2661_v31 }
  0x36   :  { %1914 = vmatprep.subr.mxu1 %v402_v41  ;;  %v296_v56 = vsub.f32 %v2638_v17, %v3753_v2  ;;  %3754 = vst [vmem:[#allocation31_spill] sm:$0xff] %v2683_v32  ;;  %1890 = vmatpush3.msra.mxu0 %v2628_v5  ;;  %v3755_v41 = vand.u32 4294901760, %v2650_v0  ;;  %v3638_v2 = vand.u32 4294901760, %v2675_v11  ;;  %v2708_v25 = vsub.f32 %v2552_v24, %v2583_v48 }
  0x37   :  { %1915 = vmatpush3.msra.mxu1 %v290_v46  ;;  %v409_v12 = vand.u32 4294901760, %v408_v47  ;;  %1891 = vmatprep.subr.mxu0 %v2641_v50  ;;  %v303_v46 = vsub.f32 %v2661_v31, %v3757_v18  ;;  %v2719_v18 = vsub.f32 %v2575_v53, %v2603_v16  ;;  %v3758_v24 = vand.u32 4294901760, %v2687_v45 }
  0x38   :  { %v415_v61 = vsub.f32 %v2650_v0, %v3755_v41  ;;  %v297_v34 = vand.u32 4294901760, %v296_v56  ;;  %1892 = vmatpush3.msra.mxu0 %v2653_v37  ;;  %v422_v56 = vsub.f32 %v2675_v11, %v3638_v2  ;;  %v2715_v0 = vand.u32 4294901760, %v2689_v54 }
  0x39   :  { %1916 = vmatprep.subr.mxu1 %v409_v12  ;;  %v304_v47 = vand.u32 4294901760, %v303_v46  ;;  %1893 = vmatprep.subr.mxu0 %v2664_v30  ;;  %v3759_v48 = vsub.s32 1, %v2382_v1  ;;  %v3760_v46 = vsub.s32 0, %v2382_v1  ;;  %v2746_v53 = vsub.f32 %v2596_v38, %v2628_v5 }
  0x3a   :  { %v416_v41 = vand.u32 4294901760, %v415_v61  ;;  %1917 = vmatpush3.msra.mxu1 %v297_v34  ;;  %v310_v61 = vsub.f32 %v2687_v45, %v3758_v24  ;;  %v423_v11 = vand.u32 4294901760, %v422_v56  ;;  %1894 = vmatpush3.msra.mxu0 %v2683_v32  ;;  %v2733_v34 = vsub.f32 %v2585_v57, %v2617_v23 }
  0x3b   :  { %v111_v2 = vrot.slane %v2699_v36, %v3759_v48  ;;  %v107_v24 = vrot.slane %v2699_v36, %v3760_v46  ;;  %1895 = vmatprep.subr.mxu0 %v2697_v40  ;;  %v3761_v48 = vand.u32 4294901760, %v2708_v25  ;;  %v3763_v57 = vand.u32 4294901760, %v2719_v18 }
  0x3c   :  { %1918 = vmatprep.subr.mxu1 %v416_v41  ;;  %v311_v12 = vand.u32 4294901760, %v310_v61  ;;  %1896 = vmatpush3.msra.mxu0 %v2715_v0  ;;  %v3765_v1 = vand.u32 4294901760, %v2733_v34 }
  0x3d   :  { %1919 = vmatpush3.msra.mxu1 %v304_v47  ;;  %v429_v41 = vsub.f32 %v2708_v25, %v3761_v48  ;;  %v2742_v56 = vand.u32 4294901760, %v111_v2  ;;  %v317_v47 = vsub.f32 %v2719_v18, %v3763_v57  ;;  %v2753_v46 = vand.u32 4294901760, %v107_v24  ;;  %1935 = vmatprep.subr.mxu0 %v2406_v22 }
  0x3e   :  { %1920 = vmatprep.subr.mxu1 %v423_v11  ;;  %v2757_v48 = vsub.f32 %v2609_v33, %v2641_v50  ;;  %v3647_v11 = vand.u32 4294901760, %v2746_v53  ;;  %v2766_v57 = vsub.f32 %v2619_v6, %v2653_v37  ;;  %v436_v5 = vsub.f32 %v2733_v34, %v3765_v1 }
  0x3f   :  { %3762 = vst [vmem:[#allocation33_spill] sm:$0xff] %v2742_v56  ;;  %3764 = vst [vmem:[#allocation34_spill] sm:$0xff] %v2753_v46  ;;  %1921 = vmatpush3.msra.mxu1 %v311_v12  ;;  %v430_v36 = vand.u32 4294901760, %v429_v41  ;;  %v2760_v38 = vsub.f32 %v111_v2, %v2742_v56  ;;  %v318_v61 = vand.u32 4294901760, %v317_v47  ;;  %v2772_v33 = vsub.f32 %v107_v24, %v2753_v46 }
  0x40   :  { %v3650_v12 = vand.u32 4294901760, %v2757_v48  ;;  %461 = vmatprep.mubr.f32.mxu1 %v2742_v56  ;;  %v324_v6 = vsub.f32 %v2746_v53, %v3647_v11  ;;  %v2783_v47 = vsub.f32 %v2630_v62, %v2664_v30  ;;  %v437_v1 = vand.u32 4294901760, %v436_v5 }
  0x41   :  { %1922 = vmatprep.subr.mxu1 %v430_v36  ;;  %v3661_v24 = vand.u32 4294901760, %v2772_v33  ;;  %v2791_v2 = vsub.f32 %v2655_v55, %v2683_v32  ;;  %v3766_v11 = vand.u32 4294901760, %v2760_v38  ;;  %v3767_v62 = vand.u32 4294901760, %v2766_v57 }
  0x42   :  { %1923 = vmatpush3.msra.mxu1 %v318_v61  ;;  %v443_v36 = vsub.f32 %v2757_v48, %v3650_v12  ;;  %v325_v56 = vand.u32 4294901760, %v324_v6  ;;  %v3660_v5 = vand.u32 4294901760, %v2783_v47  ;;  %v2806_v32 = vsub.f32 %v2666_v60, %v2697_v40 }
  0x43   :  { %v223_v41 = vsub.f32 %v2760_v38, %v3766_v11  ;;  %v331_v61 = vsub.f32 %v2766_v57, %v3767_v62  ;;  %1924 = vmatprep.subr.mxu1 %v437_v1  ;;  %v229_v12 = vsub.f32 %v2772_v33, %v3661_v24  ;;  %v3659_v55 = vand.u32 4294901760, %v2791_v2 }
  0x44   :  { %v444_v30 = vand.u32 4294901760, %v443_v36  ;;  %1925 = vmatpush3.msra.mxu1 %v325_v56  ;;  %v450_v62 = vsub.f32 %v2783_v47, %v3660_v5  ;;  %v2813_v1 = vsub.f32 %v2689_v54, %v2715_v0  ;;  %v3658_v60 = vand.u32 4294901760, %v2806_v32  ;;  %v3782_v5 = vld [vmem:[#allocation23_spill] sm:$0xff] }
  0x45   :  { %v224_v11 = vand.u32 4294901760, %v223_v41  ;;  %v332_v6 = vand.u32 4294901760, %v331_v61  ;;  %v230_v37 = vand.u32 4294901760, %v229_v12  ;;  %v338_v36 = vsub.f32 %v2791_v2, %v3659_v55  ;;  %v3781_v55 = vld [vmem:[#allocation22_spill] sm:$0xff] }
  0x46   :  { %3768 = vst [vmem:[#allocation35_spill] sm:$0xff] %v2813_v1  ;;  %1926 = vmatprep.subr.mxu1 %v444_v30  ;;  %v451_v56 = vand.u32 4294901760, %v450_v62  ;;  %v3657_v41 = vand.u32 4294901760, %v2813_v1  ;;  %v457_v54 = vsub.f32 %v2806_v32, %v3658_v60  ;;  %v3771_v62 = vld [vmem:[#allocation13_spill] sm:$0xff]  ;;  %v3783_v24 = vand.u32 4294901760, %v2406_v22 }
  0x47   :  { %225 = vmatprep.mubr.f32.mxu0 %v224_v11  ;;  %1927 = vmatpush3.msra.mxu1 %v332_v6  ;;  %v339_v61 = vand.u32 4294901760, %v338_v36  ;;  %v3770_v6 = vld [vmem:[#allocation12_spill] sm:$0xff]  ;;  %v3772_v36 = vld [vmem:[#allocation30_spill] sm:$0xff]  ;;  %v3780_v60 = vld [vmem:[#allocation21_spill] sm:$0xff]  ;;  %v3790_v22 = vand.u32 4294901760, %v2448_v39 }
  0x48   :  { %231 = vmatmul.mubr.f32.vlgmr.msra.gmra.mxu0 %v230_v37  ;;  %1928 = vmatprep.subr.mxu1 %v451_v56  ;;  %v345_v30 = vsub.f32 %v2813_v1, %v3657_v41  ;;  %v458_v12 = vand.u32 4294901760, %v457_v54  ;;  %v3769_v37 = vld [vmem:[#allocation27_spill] sm:$0xff]  ;;  %v3773_v56 = vld [vmem:[#allocation14_spill] sm:$0xff]  ;;  %v3775_v54 = vld [vmem:[#allocation16_spill] sm:$0xff] }
  0x49   :  { %1936 = vmatpush3.msra.mxu0 %v2419_v27  ;;  %1929 = vmatpush3.msra.mxu1 %v339_v61  ;;  %v3774_v61 = vld [vmem:[#allocation15_spill] sm:$0xff]  ;;  %v3779_v41 = vld [vmem:[#allocation20_spill] sm:$0xff] }
  0x4a   :  { %1937 = vmatprep.subr.mxu0 %v2425_v29  ;;  %v346_v11 = vand.u32 4294901760, %v345_v30  ;;  %598 = vmatprep.mubr.f32.mxu0 %v2760_v38  ;;  %v3776_v30 = vld [vmem:[#allocation17_spill] sm:$0xff] }
  0x4b   :  { %1938 = vmatpush3.msra.mxu0 %v2439_v35  ;;  %1930 = vmatprep.subr.mxu1 %v458_v12  ;;  %v3777_v12 = vld [vmem:[#allocation18_spill] sm:$0xff] }
  0x4c   :  { %1939 = vmatprep.subr.mxu0 %v2448_v39  ;;  %1931 = vmatpush3.msra.mxu1 %v346_v11  ;;  %v3778_v11 = vld [vmem:[#allocation19_spill] sm:$0xff]  ;;  %v3796_v39 = vand.u32 4294901760, %v2772_v33 }
  0x4d   :  { %1940 = vmatpush3.msra.mxu0 %v2461_v44  ;;  %463 = vmatmul.mubr.f32.vlgmr.msra.gmra.mxu1 %v2753_v46  ;;  %v3784_v46 = vld [vmem:[#allocation26_spill] sm:$0xff] }
  0x4e   :  { %1941 = vmatprep.subr.mxu0 %v2475_v49  ;;  %1970 = vmatprep.subr.mxu1 %v2386_v7 }
  0x4f   :  { %1942 = vmatpush3.msra.mxu0 %v2501_v63  ;;  %1971 = vmatpush3.msra.mxu1 %v2388_v8 }
  0x50   :  { %1943 = vmatprep.subr.mxu0 %v2513_v10  ;;  %1972 = vmatprep.subr.mxu1 %v2390_v9 }
  0x51   :  { %1944 = vmatpush3.msra.mxu0 %v2524_v42  ;;  %1973 = vmatpush3.msra.mxu1 %v2392_v13 }
  0x52   :  { %1945 = vmatprep.subr.mxu0 %v2535_v52  ;;  %1974 = vmatprep.subr.mxu1 %v2394_v14 }
  0x53   :  { %1946 = vmatpush3.msra.mxu0 %v2547_v58  ;;  %1975 = vmatpush3.msra.mxu1 %v2396_v15 }
  0x54   :  { %1947 = vmatprep.subr.mxu0 %v2561_v4  ;;  %1976 = vmatprep.subr.mxu1 %v2399_v19 }
  0x55   :  { %1948 = vmatpush3.msra.mxu0 %v2573_v51  ;;  %1977 = vmatpush3.msra.mxu1 %v2401_v20 }
  0x56   :  { %1949 = vmatprep.subr.mxu0 %v2594_v3  ;;  %1978 = vmatprep.subr.mxu1 %v2403_v21 }
  0x57   :  { %1950 = vmatpush3.msra.mxu0 %v2607_v59  ;;  %1979 = vmatpush3.msra.mxu1 %v2416_v26 }
  0x58   :  { %1951 = vmatprep.subr.mxu0 %v2625_v43  ;;  %1980 = vmatprep.subr.mxu1 %v2422_v28 }
  0x59   :  { %1952 = vmatpush3.msra.mxu0 %v2638_v17  ;;  %1981 = vmatpush3.msra.mxu1 %v3770_v6 }
  0x5a   :  { %1953 = vmatprep.subr.mxu0 %v3769_v37  ;;  %1982 = vmatprep.subr.mxu1 %v3771_v62 }
  0x5b   :  { %1954 = vmatpush3.msra.mxu0 %v2661_v31  ;;  %1983 = vmatpush3.msra.mxu1 %v3773_v56 }
  0x5c   :  { %1955 = vmatprep.subr.mxu0 %v3772_v36  ;;  %1984 = vmatprep.subr.mxu1 %v3774_v61 }
  0x5d   :  { %1956 = vmatpush3.msra.mxu0 %v2687_v45  ;;  %1985 = vmatpush3.msra.mxu1 %v3775_v54 }
  0x5e   :  { %1957 = vmatprep.subr.mxu0 %v2708_v25  ;;  %1986 = vmatprep.subr.mxu1 %v3776_v30 }
  0x5f   :  { %1958 = vmatpush3.msra.mxu0 %v2719_v18  ;;  %1987 = vmatpush3.msra.mxu1 %v3777_v12 }
  0x60   :  { %1959 = vmatprep.subr.mxu0 %v2733_v34  ;;  %1988 = vmatprep.subr.mxu1 %v3778_v11 }
  0x61   :  { %1960 = vmatpush3.msra.mxu0 %v2746_v53  ;;  %1989 = vmatpush3.msra.mxu1 %v3779_v41 }
  0x62   :  { %1961 = vmatprep.subr.mxu0 %v2757_v48  ;;  %1990 = vmatprep.subr.mxu1 %v3780_v60 }
  0x63   :  { %1962 = vmatpush3.msra.mxu0 %v2766_v57  ;;  %1991 = vmatpush3.msra.mxu1 %v3781_v55  ;;  %v3785_v55 = vand.u32 4294901760, %v2419_v27  ;;  %v3792_v27 = vand.u32 4294901760, %v2461_v44  ;;  %v3798_v44 = vand.u32 4294901760, %v2524_v42  ;;  %v3802_v42 = vand.u32 4294901760, %v2573_v51 }
  0x64   :  { %1963 = vmatprep.subr.mxu0 %v2783_v47  ;;  %1992 = vmatprep.subr.mxu1 %v3782_v5  ;;  %v3786_v5 = vand.u32 4294901760, %v2425_v29  ;;  %v3793_v29 = vand.u32 4294901760, %v2475_v49  ;;  %v3799_v49 = vand.u32 4294901760, %v2535_v52  ;;  %v85_v52 = vld [vmem:[#allocation5 + $0x170] sm:$0xff]  ;;  %v3805_v51 = vand.u32 4294901760, %v2625_v43 }
  0x65   :  { %1964 = vmatpush3.msra.mxu0 %v2791_v2  ;;  %1993 = vmatpush3.msra.mxu1 %v2603_v16  ;;  %v3787_v16 = vld [vmem:[#allocation28_spill] sm:$0xff] }
  0x66   :  { %1965 = vmatprep.subr.mxu0 %v2806_v32  ;;  %1994 = vmatprep.subr.mxu1 %v2617_v23  ;;  %v3789_v23 = vld [vmem:[#allocation29_spill] sm:$0xff] }
  0x67   :  { %1966 = vmatpush3.msra.mxu0 %v2813_v1  ;;  %1995 = vmatpush3.msra.mxu1 %v3784_v46  ;;  %v3788_v1 = vand.u32 4294901760, %v2439_v35  ;;  %v3794_v35 = vand.u32 4294901760, %v2760_v38 }
  0x68   :  { %601 = vmatmul.mubr.f32.vlgmr.msra.gmra.mxu0 %v2772_v33  ;;  %2005 = vmatprep.subr.mxu0 %v3783_v24  ;;  %v3791_v24 = vld [vmem:[#allocation31_spill] sm:$0xff] }
  0x69   :  { %2006 = vmatpush3.msra.mxu0 %v3785_v55  ;;  %1996 = vmatprep.subr.mxu1 %v2641_v50  ;;  %v3797_v55 = vand.u32 4294901760, %v2513_v10  ;;  %v3801_v10 = vand.u32 4294901760, %v2561_v4  ;;  %v2943_v4 = vand.u32 4294901760, %v85_v52  ;;  %v83_v33 = vld [vmem:[#allocation5 + $0x160] sm:$0xff] }
  0x6a   :  { %2007 = vmatprep.subr.mxu0 %v3786_v5  ;;  %1997 = vmatpush3.msra.mxu1 %v3787_v16  ;;  %v3795_v5 = vand.u32 4294901760, %v2501_v63  ;;  %v3800_v63 = vand.u32 4294901760, %v2547_v58 }
  0x6b   :  { %2008 = vmatpush3.msra.mxu0 %v3788_v1  ;;  %1998 = vmatprep.subr.mxu1 %v3789_v23  ;;  %3806 = vst [vmem:[#allocation27_spill] sm:$0xff] %v2943_v4 }
  0x6c   :  { %2009 = vmatprep.subr.mxu0 %v3790_v22  ;;  %1999 = vmatpush3.msra.mxu1 %v3791_v24  ;;  %v3814_v22 = vand.u32 4294901760, %v2687_v45 }
  0x6d   :  { %2010 = vmatpush3.msra.mxu0 %v3792_v27  ;;  %2000 = vmatprep.subr.mxu1 %v2697_v40  ;;  %v82_v27 = vld [vmem:[#allocation5 + $0x158] sm:$0xff] }
  0x6e   :  { %2011 = vmatprep.subr.mxu0 %v3793_v29  ;;  %2001 = vmatpush3.msra.mxu1 %v2715_v0 }
  0x6f   :  { %705 = vmatprep.mubr.f32.mxu1 %v3794_v35  ;;  %2012 = vmatpush3.msra.mxu0 %v3795_v5  ;;  %v3817_v35 = vand.u32 4294901760, %v2719_v18 }
  0x70   :  { %709 = vmatmul.mubr.f32.vlgmr.msra.gmra.mxu1 %v3796_v39  ;;  %2013 = vmatprep.subr.mxu0 %v3797_v55  ;;  %v3820_v39 = vand.u32 4294901760, %v2733_v34  ;;  %v3823_v34 = vand.u32 4294901760, %v2757_v48 }
  0x71   :  { %2040 = vmatprep.subr.mxu1 %v2386_v7  ;;  %2014 = vmatpush3.msra.mxu0 %v3798_v44  ;;  %v86_v7 = vld [vmem:[#allocation5 + $0x178] sm:$0xff]  ;;  %v3821_v44 = vand.u32 4294901760, %v2746_v53  ;;  %v3825_v53 = vand.u32 4294901760, %v2766_v57 }
  0x72   :  { %2041 = vmatpush3.msra.mxu1 %v2388_v8  ;;  %2015 = vmatprep.subr.mxu0 %v3799_v49  ;;  %v102_v8 = vld [vmem:[#allocation5 + $0x1f8] sm:$0xff]  ;;  %v2936_v58 = vand.u32 4294901760, %v86_v7  ;;  %v3005_v49 = vand.u32 4294901760, %v82_v27 }
  0x73   :  { %2042 = vmatprep.subr.mxu1 %v2390_v9  ;;  %2016 = vmatpush3.msra.mxu0 %v3800_v63  ;;  %v3803_v9 = vand.u32 4294901760, %v2594_v3  ;;  %v100_v3 = vld [vmem:[#allocation5 + $0x1e8] sm:$0xff]  ;;  %v97_v63 = vld [vmem:[#allocation5 + $0x1d0] sm:$0xff] }
  0x74   :  { %2043 = vmatpush3.msra.mxu1 %v2392_v13  ;;  %2017 = vmatprep.subr.mxu0 %v3801_v10  ;;  %v3804_v13 = vand.u32 4294901760, %v2607_v59  ;;  %v84_v59 = vld [vmem:[#allocation5 + $0x168] sm:$0xff]  ;;  %v2957_v38 = vsub.f32 %v86_v7, %v2936_v58  ;;  %3822 = vst [vmem:[#allocation17_spill] sm:$0xff] %v3005_v49 }
  0x75   :  { %2044 = vmatprep.subr.mxu1 %v2394_v14  ;;  %2018 = vmatpush3.msra.mxu0 %v3802_v42  ;;  %v101_v14 = vld [vmem:[#allocation5 + $0x1f0] sm:$0xff]  ;;  %v2967_v1 = vand.u32 4294901760, %v84_v59  ;;  %v80_v42 = vld [vmem:[#allocation5 + $0x148] sm:$0xff] }
  0x76   :  { %2045 = vmatpush3.msra.mxu1 %v2396_v15  ;;  %2019 = vmatprep.subr.mxu0 %v3803_v9  ;;  %v2941_v15 = vand.u32 4294901760, %v102_v8  ;;  %v2951_v43 = vand.u32 4294901760, %v101_v14  ;;  %v3826_v9 = vand.u32 4294901760, %v2783_v47  ;;  %v3829_v47 = vld [vmem:[#allocation22_spill] sm:$0xff] }
  0x77   :  { %2046 = vmatprep.subr.mxu1 %v2399_v19  ;;  %2020 = vmatpush3.msra.mxu0 %v3804_v13  ;;  %v3807_v19 = vand.u32 4294901760, %v2638_v17  ;;  %v2959_v17 = vand.u32 4294901760, %v100_v3  ;;  %3813 = vst [vmem:[#allocation30_spill] sm:$0xff] %v2967_v1  ;;  %v2998_v18 = vsub.f32 %v84_v59, %v2967_v1 }
  0x78   :  { %2047 = vmatpush3.msra.mxu1 %v2401_v20  ;;  %2021 = vmatprep.subr.mxu0 %v3805_v51  ;;  %v3808_v20 = vand.u32 4294901760, %v3769_v37  ;;  %3809 = vst [vmem:[#allocation12_spill] sm:$0xff] %v2951_v43  ;;  %v98_v37 = vld [vmem:[#allocation5 + $0x1d8] sm:$0xff]  ;;  %v2981_v29 = vsub.f32 %v101_v14, %v2951_v43  ;;  %v3828_v51 = vand.u32 4294901760, %v2791_v2 }
  0x79   :  { %2048 = vmatprep.subr.mxu1 %v2403_v21  ;;  %2022 = vmatpush3.msra.mxu0 %v3807_v19  ;;  %v3810_v21 = vand.u32 4294901760, %v2661_v31  ;;  %3811 = vst [vmem:[#allocation13_spill] sm:$0xff] %v2959_v17  ;;  %v99_v31 = vld [vmem:[#allocation5 + $0x1e0] sm:$0xff]  ;;  %v2988_v5 = vand.u32 4294901760, %v98_v37  ;;  %v3671_v14 = vand.u32 4294901760, %v2998_v18 }
  0x7a   :  { %2049 = vmatpush3.msra.mxu1 %v2416_v26  ;;  %2023 = vmatprep.subr.mxu0 %v3808_v20  ;;  %v3812_v26 = vand.u32 4294901760, %v3772_v36  ;;  %v3815_v36 = vand.u32 4294901760, %v2708_v25  ;;  %v2986_v45 = vand.u32 4294901760, %v99_v31  ;;  %v3670_v25 = vand.u32 4294901760, %v2957_v38  ;;  %v3831_v19 = vld [vmem:[#allocation11_spill] sm:$0xff] }
  0x7b   :  { %2050 = vmatprep.subr.mxu1 %v2422_v28  ;;  %2024 = vmatpush3.msra.mxu0 %v3810_v21  ;;  %v2965_v28 = vsub.f32 %v85_v52, %v2943_v4  ;;  %3819 = vst [vmem:[#allocation16_spill] sm:$0xff] %v2988_v5  ;;  %v3669_v10 = vand.u32 4294901760, %v2981_v29  ;;  %v3029_v52 = vsub.f32 %v98_v37, %v2988_v5  ;;  %v3832_v20 = vand.u32 4294901760, %v2806_v32  ;;  %v3833_v21 = vld [vmem:[#allocation23_spill] sm:$0xff] }
  0x7c   :  { %2051 = vmatpush3.msra.mxu1 %v3770_v6  ;;  %2025 = vmatprep.subr.mxu0 %v3812_v26  ;;  %v2970_v6 = vsub.f32 %v102_v8, %v2941_v15  ;;  %3818 = vst [vmem:[#allocation15_spill] sm:$0xff] %v2986_v45  ;;  %v3022_v48 = vsub.f32 %v2957_v38, %v3670_v25  ;;  %v79_v37 = vld [vmem:[#allocation5 + $0x140] sm:$0xff]  ;;  %v77_v25 = vld [vmem:[#allocation5 + $0x130] sm:$0xff] }
  0x7d   :  { %2052 = vmatprep.subr.mxu1 %v3771_v62  ;;  %2026 = vmatpush3.msra.mxu0 %v3814_v22  ;;  %v2978_v62 = vand.u32 4294901760, %v83_v33  ;;  %v3668_v55 = vand.u32 4294901760, %v2965_v28  ;;  %v3026_v8 = vsub.f32 %v99_v31, %v2986_v45  ;;  %v95_v31 = vld [vmem:[#allocation5 + $0x1c0] sm:$0xff] }
  0x7e   :  { %2053 = vmatpush3.msra.mxu1 %v3773_v56  ;;  %2027 = vmatprep.subr.mxu0 %v3815_v36  ;;  %v81_v56 = vld [vmem:[#allocation5 + $0x150] sm:$0xff]  ;;  %v78_v36 = vld [vmem:[#allocation5 + $0x138] sm:$0xff] }
  0x7f   :  { %2054 = vmatprep.subr.mxu1 %v3774_v61  ;;  %3816 = vst [vmem:[#allocation14_spill] sm:$0xff] %v2978_v62  ;;  %2028 = vmatpush3.msra.mxu0 %v3817_v35  ;;  %v2992_v61 = vsub.f32 %v100_v3, %v2959_v17  ;;  %v3014_v7 = vand.u32 4294901760, %v81_v56  ;;  %v3044_v13 = vsub.f32 %v2965_v28, %v3668_v55  ;;  %v3053_v3 = vand.u32 4294901760, %v80_v42  ;;  %v3838_v35 = vld [vmem:[#allocation33_spill] sm:$0xff] }
  0x80   :  { %2055 = vmatpush3.msra.mxu1 %v3775_v54  ;;  %2029 = vmatprep.subr.mxu0 %v3820_v39  ;;  %v3672_v54 = vand.u32 4294901760, %v2970_v6  ;;  %v3102_v55 = vand.u32 4294901760, %v79_v37  ;;  %v3140_v39 = vand.u32 4294901760, %v77_v25 }
  0x81   :  { %2056 = vmatprep.subr.mxu1 %v3776_v30  ;;  %2030 = vmatpush3.msra.mxu0 %v3821_v44  ;;  %v3011_v30 = vsub.f32 %v83_v33, %v2978_v62  ;;  %3824 = vst [vmem:[#allocation18_spill] sm:$0xff] %v3014_v7  ;;  %3830 = vst [vmem:[#allocation20_spill] sm:$0xff] %v3053_v3  ;;  %v3062_v33 = vsub.f32 %v2981_v29, %v3669_v10  ;;  %v3104_v10 = vand.u32 4294901760, %v78_v36 }
  0x82   :  { %2057 = vmatpush3.msra.mxu1 %v3777_v12  ;;  %2031 = vmatprep.subr.mxu0 %v3823_v34  ;;  %v96_v12 = vld [vmem:[#allocation5 + $0x1c8] sm:$0xff]  ;;  %v3037_v57 = vsub.f32 %v2970_v6, %v3672_v54  ;;  %v3065_v2 = vsub.f32 %v81_v56, %v3014_v7  ;;  %v3674_v56 = vand.u32 4294901760, %v3026_v8  ;;  %v3080_v34 = vld [vmem:[#allocation5 + $0x1b8] sm:$0xff]  ;;  %3843 = vst [vmem:[#allocation29_spill] sm:$0xff] %v3102_v55  ;;  %v3118_v54 = vld [vmem:[#allocation5 + $0x1b0] sm:$0xff] }
  0x83   :  { %2058 = vmatprep.subr.mxu1 %v3778_v11  ;;  %2032 = vmatpush3.msra.mxu0 %v3825_v53  ;;  %v3667_v11 = vand.u32 4294901760, %v2992_v61  ;;  %v3067_v26 = vand.u32 4294901760, %v96_v12  ;;  %v3673_v22 = vand.u32 4294901760, %v3011_v30  ;;  %v3675_v53 = vand.u32 4294901760, %v3029_v52  ;;  %3844 = vst [vmem:[#allocation31_spill] sm:$0xff] %v3104_v10  ;;  %3846 = vst [vmem:[#allocation11_spill] sm:$0xff] %v3140_v39 }
  0x84   :  { %2059 = vmatpush3.msra.mxu1 %v3779_v41  ;;  %2033 = vmatprep.subr.mxu0 %v3826_v9  ;;  %v3039_v41 = vand.u32 4294901760, %v97_v63  ;;  %3834 = vst [vmem:[#allocation21_spill] sm:$0xff] %v3065_v2  ;;  %v3839_v9 = vld [vmem:[#allocation24_spill] sm:$0xff] }
  0x85   :  { %2060 = vmatprep.subr.mxu1 %v3780_v60  ;;  %2034 = vmatpush3.msra.mxu0 %v3828_v51  ;;  %v3051_v60 = vsub.f32 %v82_v27, %v3005_v49  ;;  %3835 = vst [vmem:[#allocation26_spill] sm:$0xff] %v3067_v26  ;;  %v3836_v27 = vld [vmem:[#allocation35_spill] sm:$0xff]  ;;  %v3077_v44 = vsub.f32 %v2992_v61, %v3667_v11  ;;  %v3840_v51 = vld [vmem:[#allocation34_spill] sm:$0xff]  ;;  %v3100_v11 = vand.u32 4294901760, %v95_v31 }
  0x86   :  { %3827 = vst [vmem:[#allocation19_spill] sm:$0xff] %v3039_v41  ;;  %2061 = vmatpush3.msra.mxu1 %v3829_v47  ;;  %2035 = vmatprep.subr.mxu0 %v3832_v20  ;;  %v3837_v32 = vand.u32 4294901760, %v3836_v27  ;;  %v3093_v27 = vsub.f32 %v97_v63, %v3039_v41  ;;  %v3126_v20 = vsub.f32 %v3026_v8, %v3674_v56  ;;  %v3143_v47 = vld [vmem:[#allocation5 + $0x1a8] sm:$0xff]  ;;  %v75_v56 = vld [vmem:[#allocation5 + $0x120] sm:$0xff] }
  0x87   :  { %2062 = vmatprep.subr.mxu1 %v3833_v21  ;;  %875 = vmatprep.mubr.f32.mxu0 %v3838_v35  ;;  %v3090_v21 = vsub.f32 %v2998_v18, %v3671_v14  ;;  %3842 = vst [vmem:[#allocation28_spill] sm:$0xff] %v3100_v11  ;;  %v3678_v14 = vand.u32 4294901760, %v3051_v60  ;;  %v3134_v63 = vsub.f32 %v96_v12, %v3067_v26 }
  0x88   :  { %2036 = vmatpush3.msra.mxu0 %v3837_v32  ;;  %2063 = vmatpush3.msra.mxu1 %v3839_v9  ;;  %v3841_v32 = vld [vmem:[#allocation25_spill] sm:$0xff]  ;;  %v3098_v9 = vsub.f32 %v80_v42, %v3053_v3  ;;  %v3115_v42 = vand.u32 4294901760, %v3080_v34  ;;  %v3148_v12 = vsub.f32 %v79_v37, %v3102_v55  ;;  %v3157_v59 = vsub.f32 %v95_v31, %v3100_v11 }
  0x89   :  { %877 = vmatmul.mubr.f32.vlgmr.msra.gmra.mxu0 %v3840_v51  ;;  %2064 = vmatprep.subr.mxu1 %v3841_v32  ;;  %v3112_v32 = vsub.f32 %v3011_v30, %v3673_v22  ;;  %v3131_v22 = vsub.f32 %v3029_v52, %v3675_v53  ;;  %v3154_v53 = vand.u32 4294901760, %v3118_v54  ;;  %v3165_v37 = vsub.f32 %v3051_v60, %v3678_v14 }
  0x8a   :  { %2075 = vmatprep.subr.mxu0 %v2941_v15  ;;  %2065 = vmatpush3.msra.mxu1 %v3784_v46  ;;  %3845 = vst [vmem:[#allocation22_spill] sm:$0xff] %v3115_v42  ;;  %v114_v46 = vsub.s32 2, %v3831_v19  ;;  %v3850_v14 = vand.u32 4294901760, %v3093_v27 }
  0x8b   :  { %2076 = vmatpush3.msra.mxu0 %v2936_v58  ;;  %2066 = vmatprep.subr.mxu1 %v2641_v50  ;;  %3848 = vst [vmem:[#allocation35_spill] sm:$0xff] %v3154_v53  ;;  %v76_v50 = vld [vmem:[#allocation5 + $0x128] sm:$0xff] }
  0x8c   :  { %2077 = vmatprep.subr.mxu0 %v2951_v43  ;;  %2067 = vmatpush3.msra.mxu1 %v3787_v16  ;;  %v3151_v16 = vsub.f32 %v78_v36, %v3104_v10  ;;  %v3182_v36 = vsub.f32 %v3093_v27, %v3850_v14  ;;  %v3197_v14 = vand.u32 4294901760, %v75_v56 }
  0x8d   :  { %2078 = vmatpush3.msra.mxu0 %v2943_v4  ;;  %2068 = vmatprep.subr.mxu1 %v3789_v23  ;;  %v3174_v23 = vand.u32 4294901760, %v3143_v47  ;;  %v3855_v4 = vld [vmem:[#allocation32_spill] sm:$0xff] }
  0x8e   :  { %2079 = vmatprep.subr.mxu0 %v2959_v17  ;;  %3847 = vst [vmem:[#allocation23_spill] sm:$0xff] %v3151_v16  ;;  %2069 = vmatpush3.msra.mxu1 %v3791_v24  ;;  %v1236_v24 = vand.u32 4294901760, %v3126_v20  ;;  %v3851_v20 = vand.u32 4294901760, %v3065_v2  ;;  %v74_v17 = vld [vmem:[#allocation5 + $0x118] sm:$0xff]  ;;  %3853 = vst [vmem:[#allocation34_spill] sm:$0xff] %v3197_v14 }
  0x8f   :  { %2080 = vmatpush3.msra.mxu0 %v2967_v1  ;;  %2070 = vmatprep.subr.mxu1 %v2697_v40  ;;  %3849 = vst [vmem:[#allocation33_spill] sm:$0xff] %v3174_v23  ;;  %v3185_v40 = vsub.f32 %v77_v25, %v3140_v39  ;;  %v91_v1 = vld [vmem:[#allocation5 + $0x1a0] sm:$0xff]  ;;  %v3861_v25 = vand.u32 4294901760, %v3044_v13  ;;  %v3865_v13 = vand.u32 4294901760, %v3077_v44 }
  0x90   :  { %2081 = vmatprep.subr.mxu0 %v2986_v45  ;;  %2071 = vmatpush3.msra.mxu1 %v2715_v0  ;;  %v3190_v31 = vsub.f32 %v3065_v2, %v3851_v20  ;;  %v3192_v45 = vand.u32 4294901760, %v76_v50  ;;  %v3856_v20 = vand.u32 4294901760, %v3037_v57  ;;  %v1131_v2 = vand.u32 4294901760, %v3165_v37 }
  0x91   :  { %979 = vmatprep.mubr.f32.mxu1 %v3838_v35  ;;  %2082 = vmatpush3.msra.mxu0 %v2978_v62  ;;  %v3854_v35 = vsub.s32 3, %v3831_v19  ;;  %v3857_v62 = vand.u32 4294901760, %v3098_v9  ;;  %v3214_v0 = vsub.f32 %v3080_v34, %v3115_v42  ;;  %v115_v19 = vrot.slane %v3855_v4, %v114_v46 }
  0x92   :  { %3852 = vst [vmem:[#allocation24_spill] sm:$0xff] %v3192_v45  ;;  %981 = vmatmul.mubr.f32.vlgmr.msra.gmra.mxu1 %v3840_v51  ;;  %2083 = vmatprep.subr.mxu0 %v2988_v5  ;;  %v3859_v57 = vand.u32 4294901760, %v3134_v63  ;;  %v1250_v34 = vand.u32 4294901760, %v3182_v36  ;;  %v3236_v46 = vsub.f32 %v76_v50, %v3192_v45  ;;  %v3251_v36 = vsub.f32 %v75_v56, %v3197_v14 }
  0x93   :  { %v119_v43 = vrot.slane %v3855_v4, %v3854_v35  ;;  %2110 = vmatprep.subr.mxu1 %v3856_v20  ;;  %v3210_v51 = vsub.f32 %v3098_v9, %v3857_v62  ;;  %2084 = vmatpush3.msra.mxu0 %v3005_v49  ;;  %v3858_v35 = vand.u32 4294901760, %v3022_v48  ;;  %v3225_v20 = vand.u32 4294901760, %v91_v1 }
  0x94   :  { %v3223_v37 = vsub.f32 %v3134_v63, %v3859_v57  ;;  %v3227_v62 = vand.u32 4294901760, %v74_v17  ;;  %2085 = vmatprep.subr.mxu0 %v3039_v41  ;;  %v3860_v4 = vand.u32 4294901760, %v3062_v33  ;;  %v1138_v48 = vand.u32 4294901760, %v3190_v31 }
  0x95   :  { %2111 = vmatpush3.msra.mxu1 %v3858_v35  ;;  %v90_v35 = vld [vmem:[#allocation5 + $0x198] sm:$0xff]  ;;  %v3240_v57 = vsub.f32 %v3118_v54, %v3154_v53  ;;  %2086 = vmatpush3.msra.mxu0 %v3014_v7  ;;  %v3862_v33 = vand.u32 4294901760, %v3157_v59  ;;  %v3863_v50 = vand.u32 4294901760, %v3148_v12  ;;  %v73_v54 = vld [vmem:[#allocation5 + $0x110] sm:$0xff]  ;;  %v3258_v41 = vand.u32 4294901760, %v119_v43 }
  0x96   :  { %2112 = vmatprep.subr.mxu1 %v3860_v4  ;;  %2087 = vmatprep.subr.mxu0 %v3067_v26  ;;  %v89_v7 = vld [vmem:[#allocation5 + $0x190] sm:$0xff]  ;;  %v3267_v56 = vsub.f32 %v3143_v47, %v3174_v23  ;;  %v3269_v49 = vand.u32 4294901760, %v115_v19  ;;  %v1257_v26 = vand.u32 4294901760, %v3223_v37  ;;  %v3275_v44 = vand.u32 4294901760, %v90_v35  ;;  %v88_v47 = vld [vmem:[#allocation5 + $0x188] sm:$0xff] }
  0x97   :  { %2113 = vmatpush3.msra.mxu1 %v3861_v25  ;;  %v3248_v4 = vsub.f32 %v3157_v59, %v3862_v33  ;;  %v3256_v31 = vsub.f32 %v3148_v12, %v3863_v50  ;;  %3864 = vst [vmem:[#allocation25_spill] sm:$0xff] %v3258_v41  ;;  %v1145_v25 = vand.u32 4294901760, %v3210_v51  ;;  %2088 = vmatpush3.msra.mxu0 %v3053_v3  ;;  %v3867_v50 = vand.u32 4294901760, %v3090_v21 }
  0x98   :  { %2114 = vmatprep.subr.mxu1 %v3865_v13  ;;  %3866 = vst [vmem:[#allocation32_spill] sm:$0xff] %v3269_v49  ;;  %v3278_v51 = vsub.f32 %v74_v17, %v3227_v62  ;;  %v3868_v13 = vand.u32 4294901760, %v3151_v16  ;;  %2089 = vmatprep.subr.mxu0 %v3100_v11  ;;  %v3287_v21 = vand.u32 4294901760, %v73_v54  ;;  %v3291_v5 = vsub.f32 %v91_v1, %v3225_v20 }
  0x99   :  { %2115 = vmatpush3.msra.mxu1 %v3867_v50  ;;  %v72_v50 = vld [vmem:[#allocation5 + $0x108] sm:$0xff]  ;;  %2090 = vmatpush3.msra.mxu0 %v3102_v55  ;;  %v3869_v17 = vand.u32 4294901760, %v3112_v32  ;;  %v1152_v11 = vand.u32 4294901760, %v3256_v31  ;;  %v3301_v3 = vsub.f32 %v119_v43, %v3258_v41  ;;  %v3871_v37 = vand.u32 4294901760, %v3131_v22  ;;  %v71_v31 = vld [vmem:[#allocation5 + $0x100] sm:$0xff] }
  0x9a   :  { %v3283_v33 = vsub.f32 %v3151_v16, %v3868_v13  ;;  %2116 = vmatprep.subr.mxu1 %v1236_v24  ;;  %v1264_v13 = vand.u32 4294901760, %v3248_v4  ;;  %v3298_v24 = vand.u32 4294901760, %v89_v7  ;;  %2091 = vmatprep.subr.mxu0 %v3115_v42  ;;  %v3872_v1 = vand.u32 4294901760, %v3214_v0 }
  0x9b   :  { %2117 = vmatpush3.msra.mxu1 %v3869_v17  ;;  %v3309_v32 = vand.u32 4294901760, %v88_v47  ;;  %v87_v17 = vld [vmem:[#allocation5 + $0x180] sm:$0xff]  ;;  %v3313_v16 = vsub.f32 %v115_v19, %v3269_v49  ;;  %2092 = vmatpush3.msra.mxu0 %v3104_v10  ;;  %v3317_v22 = vand.u32 4294901760, %v72_v50  ;;  %v3873_v4 = vand.u32 4294901760, %v3240_v57 }
  0x9c   :  { %3870 = vst [vmem:[#allocation36_spill] sm:$0xff] %v3298_v24  ;;  %2118 = vmatprep.subr.mxu1 %v3871_v37  ;;  %v1270_v55 = vsub.f32 %v3214_v0, %v3872_v1  ;;  %v1159_v43 = vand.u32 4294901760, %v3283_v33  ;;  %v3321_v1 = vsub.f32 %v90_v35, %v3275_v44  ;;  %2093 = vmatprep.subr.mxu0 %v3154_v53  ;;  %v3335_v35 = vand.u32 4294901760, %v87_v17 }
  0x9d   :  { %2119 = vmatpush3.msra.mxu1 %v1131_v2  ;;  %v1277_v19 = vsub.f32 %v3240_v57, %v3873_v4  ;;  %v3328_v42 = vsub.f32 %v73_v54, %v3287_v21  ;;  %v3874_v2 = vand.u32 4294901760, %v3185_v40  ;;  %2094 = vmatpush3.msra.mxu0 %v3140_v39  ;;  %v3337_v37 = vand.u32 4294901760, %v71_v31 }
  0x9e   :  { %2120 = vmatprep.subr.mxu1 %v1250_v34  ;;  %v3341_v4 = vsub.f32 %v89_v7, %v3298_v24  ;;  %2095 = vmatprep.subr.mxu0 %v3174_v23  ;;  %v1271_v54 = vand.u32 4294901760, %v1270_v55  ;;  %v3351_v34 = vsub.f32 %v72_v50, %v3317_v22  ;;  %v3876_v7 = vand.u32 4294901760, %v3236_v46 }
  0x9f   :  { %v1165_v33 = vsub.f32 %v3185_v40, %v3874_v2  ;;  %2121 = vmatpush3.msra.mxu1 %v1138_v48  ;;  %v3875_v2 = vand.u32 4294901760, %v3267_v56  ;;  %2096 = vmatpush3.msra.mxu0 %v3192_v45  ;;  %v3877_v39 = vand.u32 4294901760, %v3291_v5 }
  0xa0   :  { %2122 = vmatprep.subr.mxu1 %v1257_v26  ;;  %v1172_v23 = vsub.f32 %v3236_v46, %v3876_v7  ;;  %v3358_v26 = vsub.f32 %v88_v47, %v3309_v32  ;;  %2097 = vmatprep.subr.mxu0 %v3225_v20  ;;  %v3367_v7 = vsub.f32 %v71_v31, %v3337_v37  ;;  %v3879_v47 = vand.u32 4294901760, %v3301_v3 }
  0xa1   :  { %v1284_v10 = vsub.f32 %v3267_v56, %v3875_v2  ;;  %2123 = vmatpush3.msra.mxu1 %v1145_v25  ;;  %v1278_v2 = vand.u32 4294901760, %v1277_v19  ;;  %v1166_v48 = vand.u32 4294901760, %v1165_v33  ;;  %v1291_v25 = vsub.f32 %v3291_v5, %v3877_v39  ;;  %2098 = vmatpush3.msra.mxu0 %v3197_v14 }
  0xa2   :  { %2124 = vmatprep.subr.mxu1 %v1264_v13  ;;  %3878 = vst [vmem:[#allocation37_spill] sm:$0xff] %v3367_v7  ;;  %v1085_v55 = vsub.f32 %v3301_v3, %v3879_v47  ;;  %v3374_v19 = vsub.f32 %v87_v17, %v3335_v35  ;;  %2099 = vmatprep.subr.mxu0 %v3275_v44  ;;  %v3881_v33 = vand.u32 4294901760, %v3251_v36  ;;  %v3882_v31 = vand.u32 4294901760, %v3313_v16 }
  0xa3   :  { %2125 = vmatpush3.msra.mxu1 %v1152_v11  ;;  %v1285_v39 = vand.u32 4294901760, %v1284_v10  ;;  %2100 = vmatpush3.msra.mxu0 %v3227_v62  ;;  %v1173_v47 = vand.u32 4294901760, %v1172_v23  ;;  %v3883_v17 = vand.u32 4294901760, %v3321_v1  ;;  %v3721_v14 = vand.u32 4294901760, %v3367_v7 }
  0xa4   :  { %3880 = vst [vmem:[#allocation38_spill] sm:$0xff] %v3374_v19  ;;  %2126 = vmatprep.subr.mxu1 %v1271_v54  ;;  %v1179_v11 = vsub.f32 %v3251_v36, %v3881_v33  ;;  %v1091_v50 = vsub.f32 %v3313_v16, %v3882_v31  ;;  %2101 = vmatprep.subr.mxu0 %v3298_v24  ;;  %v1292_v54 = vand.u32 4294901760, %v1291_v25  ;;  %v3884_v33 = vand.u32 4294901760, %v3278_v51 }
  0xa5   :  { %2127 = vmatpush3.msra.mxu1 %v1159_v43  ;;  %v1298_v13 = vsub.f32 %v3321_v1, %v3883_v17  ;;  %2102 = vmatpush3.msra.mxu0 %v3287_v21  ;;  %v1086_v23 = vand.u32 4294901760, %v1085_v55  ;;  %v3885_v43 = vand.u32 4294901760, %v3341_v4  ;;  %v3722_v10 = vand.u32 4294901760, %v3374_v19 }
  0xa6   :  { %2128 = vmatprep.subr.mxu1 %v1278_v2  ;;  %v1186_v31 = vsub.f32 %v3278_v51, %v3884_v33  ;;  %2103 = vmatprep.subr.mxu0 %v3309_v32  ;;  %v1180_v2 = vand.u32 4294901760, %v1179_v11  ;;  %v1092_v25 = vand.u32 4294901760, %v1091_v50  ;;  %v3886_v24 = vand.u32 4294901760, %v3328_v42 }
  0xa7   :  { %2129 = vmatpush3.msra.mxu1 %v1166_v48  ;;  %v1305_v17 = vsub.f32 %v3341_v4, %v3885_v43  ;;  %2104 = vmatpush3.msra.mxu0 %v3317_v22  ;;  %v1299_v48 = vand.u32 4294901760, %v1298_v13  ;;  %v3887_v55 = vand.u32 4294901760, %v3358_v26  ;;  %v3888_v50 = vand.u32 4294901760, %v3351_v34 }
  0xa8   :  { %2130 = vmatprep.subr.mxu1 %v1285_v39  ;;  %v1193_v33 = vsub.f32 %v3328_v42, %v3886_v24  ;;  %2105 = vmatprep.subr.mxu0 %v3335_v35  ;;  %v1187_v39 = vand.u32 4294901760, %v1186_v31  ;;  %v1319_v13 = vsub.f32 %v3374_v19, %v3722_v10  ;;  %v3906_v10 = vld [vmem:[#allocation31_spill] sm:$0xff] }
  0xa9   :  { %2131 = vmatpush3.msra.mxu1 %v1173_v47  ;;  %v1312_v43 = vsub.f32 %v3358_v26, %v3887_v55  ;;  %v1200_v11 = vsub.f32 %v3351_v34, %v3888_v50  ;;  %2106 = vmatpush3.msra.mxu0 %v3337_v37  ;;  %v1306_v24 = vand.u32 4294901760, %v1305_v17  ;;  %v3892_v55 = vld [vmem:[#allocation13_spill] sm:$0xff]  ;;  %v3895_v50 = vld [vmem:[#allocation14_spill] sm:$0xff] }
  0xaa   :  { %2132 = vmatprep.subr.mxu1 %v1292_v54  ;;  %1087 = vmatprep.mubr.f32.mxu0 %v1086_v23  ;;  %v1194_v47 = vand.u32 4294901760, %v1193_v33  ;;  %v1207_v54 = vsub.f32 %v3367_v7, %v3721_v14  ;;  %v1320_v17 = vand.u32 4294901760, %v1319_v13  ;;  %v3890_v33 = vld [vmem:[#allocation21_spill] sm:$0xff]  ;;  %v3905_v14 = vld [vmem:[#allocation22_spill] sm:$0xff] }
  0xab   :  { %2133 = vmatpush3.msra.mxu1 %v1180_v2  ;;  %1093 = vmatmul.mubr.f32.vlgmr.msra.gmra.mxu0 %v1092_v25  ;;  %v1313_v31 = vand.u32 4294901760, %v1312_v43  ;;  %v1201_v23 = vand.u32 4294901760, %v1200_v11  ;;  %v3889_v25 = vld [vmem:[#allocation12_spill] sm:$0xff]  ;;  %v3893_v43 = vld [vmem:[#allocation30_spill] sm:$0xff]  ;;  %v3898_v13 = vld [vmem:[#allocation17_spill] sm:$0xff] }
  0xac   :  { %2134 = vmatprep.subr.mxu1 %v1299_v48  ;;  %2145 = vmatprep.subr.mxu0 %v2970_v6  ;;  %v1208_v2 = vand.u32 4294901760, %v1207_v54  ;;  %v3891_v48 = vld [vmem:[#allocation27_spill] sm:$0xff]  ;;  %v3896_v11 = vld [vmem:[#allocation16_spill] sm:$0xff]  ;;  %v3900_v54 = vld [vmem:[#allocation18_spill] sm:$0xff] }
  0xad   :  { %2135 = vmatpush3.msra.mxu1 %v1187_v39  ;;  %2146 = vmatpush3.msra.mxu0 %v2957_v38  ;;  %v3894_v39 = vld [vmem:[#allocation15_spill] sm:$0xff] }
  0xae   :  { %2136 = vmatprep.subr.mxu1 %v1306_v24  ;;  %2147 = vmatprep.subr.mxu0 %v2981_v29  ;;  %v3897_v24 = vld [vmem:[#allocation23_spill] sm:$0xff] }
  0xaf   :  { %2137 = vmatpush3.msra.mxu1 %v1194_v47  ;;  %2148 = vmatpush3.msra.mxu0 %v2965_v28  ;;  %v3899_v47 = vld [vmem:[#allocation19_spill] sm:$0xff] }
  0xb0   :  { %2138 = vmatprep.subr.mxu1 %v1313_v31  ;;  %2149 = vmatprep.subr.mxu0 %v2992_v61  ;;  %v3901_v31 = vld [vmem:[#allocation26_spill] sm:$0xff] }
  0xb1   :  { %2139 = vmatpush3.msra.mxu1 %v1201_v23  ;;  %2150 = vmatpush3.msra.mxu0 %v2998_v18  ;;  %v3902_v23 = vld [vmem:[#allocation20_spill] sm:$0xff] }
  0xb2   :  { %2140 = vmatprep.subr.mxu1 %v1320_v17  ;;  %2151 = vmatprep.subr.mxu0 %v3026_v8  ;;  %v3903_v17 = vld [vmem:[#allocation28_spill] sm:$0xff] }
  0xb3   :  { %2141 = vmatpush3.msra.mxu1 %v1208_v2  ;;  %1323 = vmatprep.mubr.f32.mxu1 %v3258_v41  ;;  %v3904_v2 = vld [vmem:[#allocation29_spill] sm:$0xff] }
  0xb4   :  { %2152 = vmatpush3.msra.mxu0 %v3011_v30  ;;  %1325 = vmatmul.mubr.f32.vlgmr.msra.gmra.mxu1 %v3269_v49  ;;  %v3907_v49 = vld [vmem:[#allocation11_spill] sm:$0xff]  ;;  %v3908_v41 = vld [vmem:[#allocation33_spill] sm:$0xff] }
  0xb5   :  { %2153 = vmatprep.subr.mxu0 %v3029_v52  ;;  %2180 = vmatprep.subr.mxu1 %v2941_v15 }
  0xb6   :  { %2154 = vmatpush3.msra.mxu0 %v3051_v60  ;;  %2181 = vmatpush3.msra.mxu1 %v2936_v58 }
  0xb7   :  { %2155 = vmatprep.subr.mxu0 %v3093_v27  ;;  %2182 = vmatprep.subr.mxu1 %v3889_v25 }
  0xb8   :  { %2156 = vmatpush3.msra.mxu0 %v3890_v33  ;;  %2183 = vmatpush3.msra.mxu1 %v3891_v48 }
  0xb9   :  { %2157 = vmatprep.subr.mxu0 %v3134_v63  ;;  %2184 = vmatprep.subr.mxu1 %v3892_v55 }
  0xba   :  { %2158 = vmatpush3.msra.mxu0 %v3098_v9  ;;  %2185 = vmatpush3.msra.mxu1 %v3893_v43 }
  0xbb   :  { %2159 = vmatprep.subr.mxu0 %v3157_v59  ;;  %2186 = vmatprep.subr.mxu1 %v3894_v39 }
  0xbc   :  { %2160 = vmatpush3.msra.mxu0 %v3148_v12  ;;  %2187 = vmatpush3.msra.mxu1 %v3895_v50 }
  0xbd   :  { %2161 = vmatprep.subr.mxu0 %v3214_v0  ;;  %2188 = vmatprep.subr.mxu1 %v3896_v11 }
  0xbe   :  { %2162 = vmatpush3.msra.mxu0 %v3897_v24  ;;  %2189 = vmatpush3.msra.mxu1 %v3898_v13 }
  0xbf   :  { %2163 = vmatprep.subr.mxu0 %v3240_v57  ;;  %2190 = vmatprep.subr.mxu1 %v3899_v47 }
  0xc0   :  { %2164 = vmatpush3.msra.mxu0 %v3185_v40  ;;  %2191 = vmatpush3.msra.mxu1 %v3900_v54 }
  0xc1   :  { %2165 = vmatprep.subr.mxu0 %v3267_v56  ;;  %2192 = vmatprep.subr.mxu1 %v3901_v31 }
  0xc2   :  { %2166 = vmatpush3.msra.mxu0 %v3236_v46  ;;  %2193 = vmatpush3.msra.mxu1 %v3902_v23 }
  0xc3   :  { %2167 = vmatprep.subr.mxu0 %v3291_v5  ;;  %2194 = vmatprep.subr.mxu1 %v3903_v17 }
  0xc4   :  { %2168 = vmatpush3.msra.mxu0 %v3251_v36  ;;  %2195 = vmatpush3.msra.mxu1 %v3904_v2 }
  0xc5   :  { %2169 = vmatprep.subr.mxu0 %v3321_v1  ;;  %2196 = vmatprep.subr.mxu1 %v3905_v14 }
  0xc6   :  { %2170 = vmatpush3.msra.mxu0 %v3278_v51  ;;  %2197 = vmatpush3.msra.mxu1 %v3906_v10 }
  0xc7   :  { %2171 = vmatprep.subr.mxu0 %v3341_v4  ;;  %2198 = vmatprep.subr.mxu1 %v3154_v53  ;;  %v3909_v53 = vld [vmem:[#allocation34_spill] sm:$0xff] }
  0xc8   :  { %2172 = vmatpush3.msra.mxu0 %v3328_v42  ;;  %2199 = vmatpush3.msra.mxu1 %v3907_v49 }
  0xc9   :  { %2173 = vmatprep.subr.mxu0 %v3358_v26  ;;  %2200 = vmatprep.subr.mxu1 %v3908_v41  ;;  %v3910_v41 = vand.u32 4294901760, %v2970_v6  ;;  %v3915_v6 = vand.u32 4294901760, %v2992_v61  ;;  %v3920_v61 = vand.u32 4294901760, %v3313_v16 }
  0xca   :  { %2174 = vmatpush3.msra.mxu0 %v3351_v34  ;;  %2201 = vmatpush3.msra.mxu1 %v3192_v45  ;;  %v3911_v45 = vand.u32 4294901760, %v2957_v38  ;;  %v3916_v38 = vand.u32 4294901760, %v2998_v18  ;;  %v3922_v18 = vand.u32 4294901760, %v3051_v60  ;;  %v3928_v60 = vand.u32 4294901760, %v3148_v12 }
  0xcb   :  { %2175 = vmatprep.subr.mxu0 %v3374_v19  ;;  %2202 = vmatprep.subr.mxu1 %v3225_v20  ;;  %v3912_v19 = vld [vmem:[#allocation36_spill] sm:$0xff]  ;;  %v3935_v12 = vand.u32 4294901760, %v3291_v5  ;;  %v3939_v5 = vand.u32 4294901760, %v3341_v4 }
  0xcc   :  { %2176 = vmatpush3.msra.mxu0 %v3367_v7  ;;  %1460 = vmatprep.mubr.f32.mxu0 %v3301_v3  ;;  %v3913_v7 = vand.u32 4294901760, %v2981_v29  ;;  %v3917_v29 = vand.u32 4294901760, %v3026_v8  ;;  %v3923_v8 = vand.u32 4294901760, %v3093_v27  ;;  %v3932_v27 = vand.u32 4294901760, %v3185_v40 }
  0xcd   :  { %2203 = vmatpush3.msra.mxu1 %v3909_v53  ;;  %1463 = vmatmul.mubr.f32.vlgmr.msra.gmra.mxu0 %v3313_v16  ;;  %v3914_v53 = vand.u32 4294901760, %v2965_v28  ;;  %v3918_v28 = vand.u32 4294901760, %v3301_v3  ;;  %v3929_v3 = vand.u32 4294901760, %v3214_v0  ;;  %v3936_v16 = vand.u32 4294901760, %v3251_v36 }
  0xce   :  { %2204 = vmatprep.subr.mxu1 %v3275_v44  ;;  %2215 = vmatprep.subr.mxu0 %v3910_v41  ;;  %v3921_v41 = vand.u32 4294901760, %v3029_v52  ;;  %v3925_v52 = vand.u32 4294901760, %v3134_v63  ;;  %v3934_v63 = vand.u32 4294901760, %v3236_v46  ;;  %v3937_v40 = vand.u32 4294901760, %v3321_v1  ;;  %v3940_v46 = vld [vmem:[#allocation35_spill] sm:$0xff]  ;;  %v3946_v1 = vld [vmem:[#allocation38_spill] sm:$0xff] }
  0xcf   :  { %2205 = vmatpush3.msra.mxu1 %v3227_v62  ;;  %2216 = vmatpush3.msra.mxu0 %v3911_v45  ;;  %v3919_v45 = vand.u32 4294901760, %v3011_v30  ;;  %v3924_v30 = vand.u32 4294901760, %v3890_v33  ;;  %v3938_v0 = vand.u32 4294901760, %v3278_v51  ;;  %v3942_v36 = vand.u32 4294901760, %v3358_v26  ;;  %v3945_v51 = vld [vmem:[#allocation24_spill] sm:$0xff] }
  0xd0   :  { %2206 = vmatprep.subr.mxu1 %v3912_v19  ;;  %2217 = vmatprep.subr.mxu0 %v3913_v7  ;;  %v3947_v4 = vand.u32 4294901760, %v3946_v1  ;;  %v3948_v7 = vld [vmem:[#allocation37_spill] sm:$0xff]  ;;  %v3952_v26 = vld [vmem:[#allocation32_spill] sm:$0xff] }
  0xd1   :  { %2207 = vmatpush3.msra.mxu1 %v3287_v21  ;;  %2218 = vmatpush3.msra.mxu0 %v3914_v53  ;;  %v3930_v53 = vand.u32 4294901760, %v3897_v24 }
  0xd2   :  { %2208 = vmatprep.subr.mxu1 %v3309_v32  ;;  %2219 = vmatprep.subr.mxu0 %v3915_v6 }
  0xd3   :  { %2209 = vmatpush3.msra.mxu1 %v3317_v22  ;;  %2220 = vmatpush3.msra.mxu0 %v3916_v38 }
  0xd4   :  { %2210 = vmatprep.subr.mxu1 %v3335_v35  ;;  %2221 = vmatprep.subr.mxu0 %v3917_v29 }
  0xd5   :  { %2211 = vmatpush3.msra.mxu1 %v3337_v37  ;;  %1567 = vmatprep.mubr.f32.mxu1 %v3918_v28 }
  0xd6   :  { %2222 = vmatpush3.msra.mxu0 %v3919_v45  ;;  %1571 = vmatmul.mubr.f32.vlgmr.msra.gmra.mxu1 %v3920_v61 }
  0xd7   :  { %2223 = vmatprep.subr.mxu0 %v3921_v41  ;;  %2250 = vmatprep.subr.mxu1 %v2941_v15  ;;  %v3926_v15 = vand.u32 4294901760, %v3098_v9  ;;  %v3933_v9 = vand.u32 4294901760, %v3267_v56  ;;  %v3943_v56 = vld [vmem:[#allocation33_spill] sm:$0xff] }
  0xd8   :  { %2224 = vmatpush3.msra.mxu0 %v3922_v18  ;;  %2251 = vmatpush3.msra.mxu1 %v2936_v58  ;;  %v3927_v58 = vand.u32 4294901760, %v3157_v59  ;;  %v3931_v59 = vand.u32 4294901760, %v3240_v57  ;;  %v3941_v57 = vand.u32 4294901760, %v3328_v42  ;;  %v3949_v42 = vand.u32 4294901760, %v3948_v7 }
  0xd9   :  { %2225 = vmatprep.subr.mxu0 %v3923_v8  ;;  %2252 = vmatprep.subr.mxu1 %v3889_v25 }
  0xda   :  { %2226 = vmatpush3.msra.mxu0 %v3924_v30  ;;  %2253 = vmatpush3.msra.mxu1 %v3891_v48 }
  0xdb   :  { %2227 = vmatprep.subr.mxu0 %v3925_v52  ;;  %2254 = vmatprep.subr.mxu1 %v3892_v55 }
  0xdc   :  { %2228 = vmatpush3.msra.mxu0 %v3926_v15  ;;  %2255 = vmatpush3.msra.mxu1 %v3893_v43 }
  0xdd   :  { %2229 = vmatprep.subr.mxu0 %v3927_v58  ;;  %2256 = vmatprep.subr.mxu1 %v3894_v39 }
  0xde   :  { %2230 = vmatpush3.msra.mxu0 %v3928_v60  ;;  %2257 = vmatpush3.msra.mxu1 %v3895_v50 }
  0xdf   :  { %2231 = vmatprep.subr.mxu0 %v3929_v3  ;;  %2258 = vmatprep.subr.mxu1 %v3896_v11 }
  0xe0   :  { %2232 = vmatpush3.msra.mxu0 %v3930_v53  ;;  %2259 = vmatpush3.msra.mxu1 %v3898_v13 }
  0xe1   :  { %2233 = vmatprep.subr.mxu0 %v3931_v59  ;;  %2260 = vmatprep.subr.mxu1 %v3899_v47 }
  0xe2   :  { %2234 = vmatpush3.msra.mxu0 %v3932_v27  ;;  %2261 = vmatpush3.msra.mxu1 %v3900_v54 }
  0xe3   :  { %2235 = vmatprep.subr.mxu0 %v3933_v9  ;;  %2262 = vmatprep.subr.mxu1 %v3901_v31 }
  0xe4   :  { %2236 = vmatpush3.msra.mxu0 %v3934_v63  ;;  %2263 = vmatpush3.msra.mxu1 %v3902_v23 }
  0xe5   :  { %2237 = vmatprep.subr.mxu0 %v3935_v12  ;;  %2264 = vmatprep.subr.mxu1 %v3903_v17 }
  0xe6   :  { %2238 = vmatpush3.msra.mxu0 %v3936_v16  ;;  %2265 = vmatpush3.msra.mxu1 %v3904_v2 }
  0xe7   :  { %2239 = vmatprep.subr.mxu0 %v3937_v40  ;;  %2266 = vmatprep.subr.mxu1 %v3905_v14  ;;  %v3944_v14 = vand.u32 4294901760, %v3351_v34 }
  0xe8   :  { %2240 = vmatpush3.msra.mxu0 %v3938_v0  ;;  %2267 = vmatpush3.msra.mxu1 %v3906_v10  ;;  %v3950_v10 = vld [vmem:[#allocation25_spill] sm:$0xff] }
  0xe9   :  { %2241 = vmatprep.subr.mxu0 %v3939_v5  ;;  %2268 = vmatprep.subr.mxu1 %v3940_v46 }
  0xea   :  { %2242 = vmatpush3.msra.mxu0 %v3941_v57  ;;  %2269 = vmatpush3.msra.mxu1 %v3907_v49  ;;  %v3951_v49 = vld [vmem:[#allocation34_spill] sm:$0xff] }
  0xeb   :  { %2243 = vmatprep.subr.mxu0 %v3942_v36  ;;  %2270 = vmatprep.subr.mxu1 %v3943_v56 }
  0xec   :  { %2244 = vmatpush3.msra.mxu0 %v3944_v14  ;;  %2271 = vmatpush3.msra.mxu1 %v3945_v51 }
  0xed   :  { %2245 = vmatprep.subr.mxu0 %v3947_v4  ;;  %2272 = vmatprep.subr.mxu1 %v3225_v20 }
  0xee   :  { %2246 = vmatpush3.msra.mxu0 %v3949_v42  ;;  %1737 = vmatprep.mubr.f32.mxu0 %v3950_v10 }
  0xef   :  { %2273 = vmatpush3.msra.mxu1 %v3951_v49  ;;  %1739 = vmatmul.mubr.f32.vlgmr.msra.gmra.mxu0 %v3952_v26 }
  0xf0   :  { %2274 = vmatprep.subr.mxu1 %v3275_v44  ;;  %1841 = vmatprep.mubr.f32.mxu1 %v3950_v10 }
  0xf1   :  { %2275 = vmatpush3.msra.mxu1 %v3227_v62 }
  0xf2   :  { %2276 = vmatprep.subr.mxu1 %v3912_v19 }
  0xf3   :  { %2277 = vmatpush3.msra.mxu1 %v3287_v21 }
  0xf4   :  { %2278 = vmatprep.subr.mxu1 %v3309_v32 }
  0xf5   :  { %2279 = vmatpush3.msra.mxu1 %v3317_v22 }
  0xf6   :  { %2280 = vmatprep.subr.mxu1 %v3335_v35 }
  0xf7   :  { %2281 = vmatpush3.msra.mxu1 %v3337_v37 }
  0xf8   :  { %1843 = vmatmul.mubr.f32.vlgmr.msra.gmra.mxu1 %v3952_v26 }
 0x108   :  { %v1897_v20 = vpop.f32.mrf.mxu0 }
 0x10a   :  { %v1898_v44 = vpop.f32.mrf.mxu0 }
 0x10b   :  { %v1899_v50 = vadd.f32 %v1898_v44, %v1897_v20 }
 0x10d   :  { %v1932_v34 = vpop.f32.mrf.mxu1 }
 0x10f   :  { %v1933_v33 = vpop.f32.mrf.mxu1 }
 0x110   :  { %v1934_v39 = vadd.f32 %v1933_v33, %v1932_v34 }
 0x112   :  { %v465_v24 = vadd.f32 %v1934_v39, %v1899_v50 }
 0x128   :  { %v1967_v25 = vpop.f32.mrf.mxu0 }
 0x12a   :  { %v1968_v62 = vpop.f32.mrf.mxu0 }
 0x12b   :  { %v1969_v35 = vadd.f32 %v1968_v62, %v1967_v25 }
 0x12d   :  { %v603_v54 = vadd.f32 %v1969_v35, %v465_v24 }
 0x130   :  { %v2002_v48 = vpop.f32.mrf.mxu1 }
 0x132   :  { %v2003_v55 = vpop.f32.mrf.mxu1 }
 0x133   :  { %v2004_v13 = vadd.f32 %v2003_v55, %v2002_v48 }
 0x135   :  { %v711_v17 = vadd.f32 %v2004_v13, %v603_v54 }
 0x149   :  { %v2037_v19 = vpop.f32.mrf.mxu0 }
 0x14b   :  { %v2038_v21 = vpop.f32.mrf.mxu0 }
 0x14c   :  { %v2039_v31 = vadd.f32 %v2038_v21, %v2037_v19 }
 0x14e   :  { %v879_v29 = vadd.f32 %v2039_v31, %v711_v17 }
 0x152   :  { %v2072_v43 = vpop.f32.mrf.mxu1 }
 0x154   :  { %v2073_v22 = vpop.f32.mrf.mxu1 }
 0x155   :  { %v2074_v2 = vadd.f32 %v2073_v22, %v2072_v43 }
 0x157   :  { %v983_v61 = vadd.f32 %v2074_v2, %v879_v29 }
 0x16b   :  { %v2107_v32 = vpop.f32.mrf.mxu0 }
 0x16d   :  { %v2108_v11 = vpop.f32.mrf.mxu0 }
 0x16e   :  { %v2109_v28 = vadd.f32 %v2108_v11, %v2107_v32 }
 0x170   :  { %v1095_v8 = vadd.f32 %v2109_v28, %v983_v61 }
 0x174   :  { %v2142_v37 = vpop.f32.mrf.mxu1 }
 0x176   :  { %v2143_v23 = vpop.f32.mrf.mxu1 }
 0x177   :  { %v2144_v41 = vadd.f32 %v2143_v23, %v2142_v37 }
 0x179   :  { %v1327_v15 = vadd.f32 %v2144_v41, %v1095_v8 }
 0x18d   :  { %v2177_v47 = vpop.f32.mrf.mxu0 }
 0x18f   :  { %v2178_v6 = vpop.f32.mrf.mxu0 }
 0x190   :  { %v2179_v30 = vadd.f32 %v2178_v6, %v2177_v47 }
 0x192   :  { %v1465_v60 = vadd.f32 %v2179_v30, %v1327_v15 }
 0x196   :  { %v2212_v38 = vpop.f32.mrf.mxu1 }
 0x198   :  { %v2213_v18 = vpop.f32.mrf.mxu1 }
 0x199   :  { %v2214_v58 = vadd.f32 %v2213_v18, %v2212_v38 }
 0x19b   :  { %v1573_v59 = vadd.f32 %v2214_v58, %v1465_v60 }
 0x1af   :  { %v2247_v45 = vpop.f32.mrf.mxu0 }
 0x1b1   :  { %v2248_v52 = vpop.f32.mrf.mxu0 }
 0x1b2   :  { %v2249_v3 = vadd.f32 %v2248_v52, %v2247_v45 }
 0x1b4   :  { %v1741_v9 = vadd.f32 %v2249_v3, %v1573_v59 }
 0x1b8   :  { %v2282_v53 = vpop.f32.mrf.mxu1 }
 0x1ba   :  { %v2283_v27 = vpop.f32.mrf.mxu1 }
 0x1bb   :  { %v2284_v63 = vadd.f32 %v2283_v27, %v2282_v53 }
 0x1bd   :  { %v1845_v12 = vadd.f32 %v2284_v63, %v1741_v9 }
 0x1bf   :  { %1848 = vst [vmem:[#allocation7] sm:$0x1] %v1845_v12 }
 0x1c0   :  { %2341 = shalt.err (!%p2338_p0)
}
 0x1c1   :  { %1858 = dma.vmem_to_hbm [thread:$0]  %s1856_s1, 16, %s3596_s2, [#allocation4]  }
 0x1c2   :  { %2354 = dma.done.wait [#allocation4], 16  }
 0x1c3   :  { %2355 = vsyncadd [#allocation4], 4294967280 }
 0x1c4   :  { %1862 = vsyncpa [#allocation3], 1 }
 0x1c5   :  { %1863 = vsyncpa [#allocation6], 1 }
 0x1c6   :  { %1864 = vsyncpa [#allocation4], 1 }

</bundles_post_ra>
